<compile_context>
chip_gen: v7x
topology: tpu7x:2x2x1
jax: 0.10.0
libtpu: 0.0.40
codegen_flags: <defaults>
</compile_context>

<pallas_src>
import jax
import jax.numpy as jnp
from jax.experimental import pallas as pl
from jax.experimental.pallas import tpu as pltpu


# ------------------------------- helpers --------------------------------------
def _round_up(x, m):
    return ((x + m - 1) // m) * m


def _pick_divisor(dim, target):
    """Largest divisor of `dim` that is <= target (falls back to dim)."""
    if dim <= target:
        return dim
    for t in range(target, 0, -1):
        if dim % t == 0:
            return t
    return dim


def _vmem_limit_bytes():
    """Generation-aware scoped-VMEM limit (v7x: 64 MiB physical)."""
    try:
        cap = int(pltpu.get_tpu_info().vmem_capacity_bytes)
        return min(cap // 2, 48 * 1024 * 1024)
    except Exception:
        return 32 * 1024 * 1024   # safe on every generation


_VMEM_LIMIT = _vmem_limit_bytes()


def _sigmoid(x):
    # Logistic via tanh: EUP tanh instead of a VPU divide in the lowering.
    return 0.5 * jnp.tanh(0.5 * x) + 0.5


# ---------------------- Tiled linear kernel (x@W + b) ------------------------
def _linear_kernel(x_ref, w_ref, b_ref, o_ref):
    o_ref[...] = (jnp.dot(x_ref[...], w_ref[...],
                          preferred_element_type=jnp.float32)
                  + b_ref[...]).astype(o_ref.dtype)


def linear_pallas(x, w_t, b, *, tile_n=512, tile_v=512, out_dtype=jnp.float32):
    """x: (N, K) bf16; w_t: (K, V) bf16; b: (1, V) f32 -> (N, V) out_dtype.

    Weight/vocab tiles sit on the OUTER grid axis so the (K, tv) weight block
    is invariant across the inner activation axis (loaded once per vocab tile,
    not re-streamed N/tn times from HBM)."""
    n, k = x.shape
    v = w_t.shape[1]
    # Pad to (8, 128)-friendly tiles instead of falling back to odd divisors.
    tn = min(tile_n, _round_up(n, 8))
    tv = min(tile_v, _round_up(v, 128))
    n_pad = _round_up(n, tn)
    v_pad = _round_up(v, tv)
    if n_pad != n:
        x = jnp.pad(x, ((0, n_pad - n), (0, 0)))
    if v_pad != v:
        w_t = jnp.pad(w_t, ((0, 0), (0, v_pad - v)))
        b = jnp.pad(b, ((0, 0), (0, v_pad - v)))

    out = pl.pallas_call(
        _linear_kernel,
        out_shape=jax.ShapeDtypeStruct((n_pad, v_pad), out_dtype),
        grid=(v_pad // tv, n_pad // tn),          # weight tile on outer axis
        in_specs=[
            pl.BlockSpec((tn, k), lambda vj, ni: (ni, 0)),
            pl.BlockSpec((k, tv), lambda vj, ni: (0, vj)),   # invariant in ni
            pl.BlockSpec((1, tv), lambda vj, ni: (0, vj)),
        ],
        out_specs=pl.BlockSpec((tn, tv), lambda vj, ni: (ni, vj)),
        compiler_params=pltpu.CompilerParams(
            dimension_semantics=("parallel", "parallel"),
            vmem_limit_bytes=_VMEM_LIMIT),
    )(x, w_t, b)
    if n_pad != n or v_pad != v:
        out = out[:n, :v]
    return out


# ----------------------------- LSTM kernel -----------------------------------
def _lstm_kernel(gx_ref, whh_ref, h0_ref, c0_ref,
                 out_ref, hN_ref, cN_ref, h_scr, c_scr):
    blk = pl.program_id(0)

    @pl.when(blk == 0)
    def _():
        h_scr[...] = h0_ref[...]
        c_scr[...] = c0_ref[...]

    hidden = whh_ref.shape[0]
    t_blk = out_ref.shape[0]

    def step(i, carry):
        h_prev = h_scr[...]          # (batch, H) f32
        c_prev = c_scr[...]          # (batch, H) f32
        # Only the recurrent matmul stays in the time loop; x@Wih + bias
        # arrives precomputed (bf16) in gx_ref.
        gates = (jnp.dot(h_prev.astype(jnp.bfloat16), whh_ref[...],
                         preferred_element_type=jnp.float32)
                 + gx_ref[i].astype(jnp.float32))   # (batch, 4H): i,f,g,o
        # H is a multiple of 128 at the call sites -> lane-aligned slices.
        i_g = _sigmoid(gates[:, 0 * hidden:1 * hidden])
        f_g = _sigmoid(gates[:, 1 * hidden:2 * hidden])
        g_g = jnp.tanh(gates[:, 2 * hidden:3 * hidden])
        o_g = _sigmoid(gates[:, 3 * hidden:4 * hidden])
        c_new = f_g * c_prev + i_g * g_g
        h_new = o_g * jnp.tanh(c_new)
        h_scr[...] = h_new
        c_scr[...] = c_new
        out_ref[i] = h_new.astype(out_ref.dtype)    # bf16 store
        return carry

    # Bounded unroll: amortizes loop overhead without code-size blowup.
    jax.lax.fori_loop(0, t_blk, step, 0, unroll=8)

    # Grid-invariant out_spec: block stays resident, single final writeback.
    @pl.when(blk == pl.num_programs(0) - 1)
    def _():
        hN_ref[...] = h_scr[...]
        cN_ref[...] = c_scr[...]


def lstm_pallas(gx, whh_t, h0, c0, *, t_blk=32):
    """gx: (seq, batch, 4H) bf16 (precomputed x@Wih + b); whh_t: (H, 4H) bf16;
    h0/c0: (batch, H) f32.  Returns (all h_t (seq,batch,H) bf16,
    h_N (batch,H) f32, c_N (batch,H) f32)."""
    seq, batch, four_h = gx.shape
    hidden = four_h // 4
    tb = _pick_divisor(seq, t_blk)
    out_shapes = (
        jax.ShapeDtypeStruct((seq, batch, hidden), jnp.bfloat16),  # all h_t
        jax.ShapeDtypeStruct((batch, hidden), jnp.float32),        # h_N
        jax.ShapeDtypeStruct((batch, hidden), jnp.float32),        # c_N
    )
    return pl.pallas_call(
        _lstm_kernel,
        out_shape=out_shapes,
        grid=(seq // tb,),
        in_specs=[
            pl.BlockSpec((tb, batch, four_h), lambda t: (t, 0, 0)),
            pl.BlockSpec((hidden, four_h), lambda t: (0, 0)),
            pl.BlockSpec((batch, hidden), lambda t: (0, 0)),
            pl.BlockSpec((batch, hidden), lambda t: (0, 0)),
        ],
        out_specs=(
            pl.BlockSpec((tb, batch, hidden), lambda t: (t, 0, 0)),
            pl.BlockSpec((batch, hidden), lambda t: (0, 0)),
            pl.BlockSpec((batch, hidden), lambda t: (0, 0)),
        ),
        scratch_shapes=[
            pltpu.VMEM((batch, hidden), jnp.float32),
            pltpu.VMEM((batch, hidden), jnp.float32),
        ],
        compiler_params=pltpu.CompilerParams(
            dimension_semantics=("arbitrary",),
            vmem_limit_bytes=_VMEM_LIMIT),
    )(gx, whh_t, h0, c0)


# ------------------------------ Model wrapper --------------------------------
class RNNModelPallas:
    def __init__(self, vocab_size, embed_size, hidden_size, key):
        self.vocab_size = vocab_size
        self.embed_size = embed_size
        self.hidden_size = hidden_size
        ks = jax.random.split(key, 7)
        s = 1.0 / jnp.sqrt(hidden_size)
        self.embed_w = jax.random.normal(ks[0], (vocab_size, embed_size),
                                         jnp.float32)
        # PyTorch LSTM params: weight_ih (4H, E), weight_hh (4H, H), two biases.
        w_ih = jax.random.uniform(ks[1], (4 * hidden_size, embed_size),
                                  jnp.float32, -s, s)
        w_hh = jax.random.uniform(ks[2], (4 * hidden_size, hidden_size),
                                  jnp.float32, -s, s)
        b_ih = jax.random.uniform(ks[3], (4 * hidden_size,), jnp.float32, -s, s)
        b_hh = jax.random.uniform(ks[4], (4 * hidden_size,), jnp.float32, -s, s)
        # bf16 matmul operands (MXU-native); biases & gate math stay f32.
        self.wih_t = w_ih.T.astype(jnp.bfloat16)     # (E, 4H)
        self.whh_t = w_hh.T.astype(jnp.bfloat16)     # (H, 4H)
        self.lstm_bias = (b_ih + b_hh)[None, :]      # (1, 4H) f32
        # Linear: weight (V, H), bias (V,)
        w_lin = jax.random.uniform(ks[5], (vocab_size, hidden_size),
                                   jnp.float32, -s, s)
        b_lin = jax.random.uniform(ks[6], (vocab_size,), jnp.float32, -s, s)
        self.lin_w_t = w_lin.T.astype(jnp.bfloat16)  # (H, V)
        self.lin_b = b_lin[None, :]                  # (1, V) f32

    def init_hidden(self, batch_size):
        z = jnp.zeros((1, batch_size, self.hidden_size), jnp.float32)
        return (z, z)

    def forward(self, text, hidden):
        """text: (seq, batch) int32; hidden: (h0, c0) each (1, batch, H)."""
        h0, c0 = hidden
        seq, batch = text.shape
        # Embedding gather: plain-JAX glue.
        embed = jnp.take(self.embed_w, text, axis=0)           # (seq, batch, E)
        # Hoisted, time-parallel input projection -> bf16 gate pre-activations.
        gx = linear_pallas(
            embed.reshape(seq * batch, self.embed_size).astype(jnp.bfloat16),
            self.wih_t, self.lstm_bias,
            out_dtype=jnp.bfloat16)                            # (seq*batch, 4H)
        gx = gx.reshape(seq, batch, 4 * self.hidden_size)
        out, hN, cN = lstm_pallas(gx, self.whh_t, h0[0], c0[0])
        # `out` is already bf16 — feeds the logits matmul directly.
        logits = linear_pallas(
            out.reshape(seq * batch, self.hidden_size),
            self.lin_w_t, self.lin_b, out_dtype=jnp.float32)   # (seq*batch, V)
        return logits, (hN[None], cN[None])


# --------------------------- Pure-JAX reference -------------------------------
def _bf16_dot(a, b_bf16):
    return jnp.dot(a.astype(jnp.bfloat16), b_bf16,
                   preferred_element_type=jnp.float32)


def _reference(model, text, hidden):
    # Mirrors the kernel's numerical path (bf16 weights / bf16 gx / bf16 h_t
    # stream, f32 state carry) so the comparison isolates kernel correctness.
    h, c = hidden[0][0], hidden[1][0]
    x = jnp.take(model.embed_w, text, axis=0)
    seq, b, _ = x.shape
    gx = (_bf16_dot(x.reshape(seq * b, -1), model.wih_t) + model.lstm_bias)
    gx = gx.astype(jnp.bfloat16).reshape(seq, b, -1)

    def step(carry, g_t):
        h, c = carry
        gates = _bf16_dot(h, model.whh_t) + g_t.astype(jnp.float32)
        i, f, g, o = jnp.split(gates, 4, axis=-1)
        i, f, o = jax.nn.sigmoid(i), jax.nn.sigmoid(f), jax.nn.sigmoid(o)
        g = jnp.tanh(g)
        c = f * c + i * g
        h = o * jnp.tanh(c)
        return (h, c), h

    (hN, cN), outs = jax.lax.scan(step, (h, c), gx)
    logits = (_bf16_dot(outs.reshape(-1, model.hidden_size), model.lin_w_t)
              + model.lin_b)
    return logits, (hN[None], cN[None])


if __name__ == "__main__":
    # Small but lane/sublane-aligned shapes: H=128 (gate slices lane-aligned),
    # batch=8 (full sublane), vocab=256, seq=64 (two 32-step LSTM grid blocks).
    vocab_size, embed_size, hidden_size = 256, 128, 128
    seq_len, batch = 64, 8

    key = jax.random.PRNGKey(0)
    k_param, k_text = jax.random.split(key)
    model = RNNModelPallas(vocab_size, embed_size, hidden_size, k_param)

    text = jax.random.randint(k_text, (seq_len, batch), 0, vocab_size,
                              dtype=jnp.int32)
    hidden = model.init_hidden(batch)

    logits, (hN, cN) = model.forward(text, hidden)
    jax.block_until_ready((logits, hN, cN))

    ref_logits, (ref_hN, ref_cN) = _reference(model, text, hidden)
    assert logits.shape == (seq_len * batch, vocab_size)
    assert hN.shape == (1, batch, hidden_size)
    assert cN.shape == (1, batch, hidden_size)
    assert jnp.allclose(logits, ref_logits, atol=2e-2, rtol=2e-2)
    assert jnp.allclose(hN, ref_hN, atol=2e-2, rtol=2e-2)
    assert jnp.allclose(cN, ref_cN, atol=2e-2, rtol=2e-2)

    print("KERNEL_OK")
</pallas_src>

<mosaic_0001>
module attributes {stable_mosaic.version = 11 : i64} {
  func.func @_linear_kernel(%arg0: i32, %arg1: i32, %arg2: memref<512x128xbf16, #tpu.memory_space<vmem>>, %arg3: memref<128x512xbf16, #tpu.memory_space<vmem>>, %arg4: memref<1x512xf32, #tpu.memory_space<vmem>>, %arg5: memref<512x512xbf16, #tpu.memory_space<vmem>>) attributes {dimension_semantics = [#tpu.dimension_semantics<parallel>, #tpu.dimension_semantics<parallel>], iteration_bounds = array<i64: 1, 1>, scalar_prefetch = 0 : i64, scratch_operands = 0 : i64, tpu.core_type = #tpu.core_type<tc>, window_params = [{transform_indices = @transform_0, window_bounds = array<i64: 512, 128>}, {transform_indices = @transform_1, window_bounds = array<i64: 128, 512>}, {transform_indices = @transform_2, window_bounds = array<i64: 1, 512>}, {transform_indices = @transform_3, window_bounds = array<i64: 512, 512>}]} {
    %c0 = arith.constant 0 : index
    %c0_0 = arith.constant 0 : index
    %0 = vector.load %arg2[%c0, %c0_0] : memref<512x128xbf16, #tpu.memory_space<vmem>>, vector<512x128xbf16>
    %c0_1 = arith.constant 0 : index
    %c0_2 = arith.constant 0 : index
    %1 = vector.load %arg3[%c0_1, %c0_2] : memref<128x512xbf16, #tpu.memory_space<vmem>>, vector<128x512xbf16>
    %cst = arith.constant dense<0.000000e+00> : vector<512x512xf32>
    %2 = tpu.matmul %0, %1, %cst {dimension_numbers = #tpu.dot_dimension_numbers<[1], [0], [0], [1], [0, 0, 1, 1], [], []>} : vector<512x128xbf16>, vector<128x512xbf16>, vector<512x512xf32> -> vector<512x512xf32>
    %c0_3 = arith.constant 0 : index
    %c0_4 = arith.constant 0 : index
    %3 = vector.load %arg4[%c0_3, %c0_4] : memref<1x512xf32, #tpu.memory_space<vmem>>, vector<1x512xf32>
    %4 = vector.broadcast %3 : vector<1x512xf32> to vector<512x512xf32>
    %5 = arith.addf %2, %4 : vector<512x512xf32>
    %6 = arith.truncf %5 : vector<512x512xf32> to vector<512x512xbf16>
    %c0_5 = arith.constant 0 : index
    %c0_6 = arith.constant 0 : index
    %7 = vector.load %arg5[%c0_5, %c0_6] : memref<512x512xbf16, #tpu.memory_space<vmem>>, vector<512x512xbf16>
    tpu.vector_store %arg5[%c0_5, %c0_6], %6 {strides = array<i32>} : memref<512x512xbf16, #tpu.memory_space<vmem>>, vector<512x512xbf16>,
    return
  }
  func.func @transform_0(%arg0: i32, %arg1: i32) -> (i32, i32) {
    %c0_i32 = arith.constant 0 : i32
    %c0_i32_0 = arith.constant 0 : i32
    return %arg1, %c0_i32 : i32, i32
  }
  func.func @transform_1(%arg0: i32, %arg1: i32) -> (i32, i32) {
    %c0_i32 = arith.constant 0 : i32
    %c0_i32_0 = arith.constant 0 : i32
    return %c0_i32, %arg0 : i32, i32
  }
  func.func @transform_2(%arg0: i32, %arg1: i32) -> (i32, i32) {
    %c0_i32 = arith.constant 0 : i32
    %c0_i32_0 = arith.constant 0 : i32
    return %c0_i32, %arg0 : i32, i32
  }
  func.func @transform_3(%arg0: i32, %arg1: i32) -> (i32, i32) {
    %c0_i32 = arith.constant 0 : i32
    return %arg1, %arg0 : i32, i32
  }
}

</mosaic_0001>

<bundles_post_ra>
// kernel: tpu_custom_call.1
= control target key start
LH: loop header
LB: loop body
LE: loop exit
PB: predicated region body
PF: predicated region fallthrough
CT: control target
= control target key end

     0   :  { %8 = vsyncpa [#allocation3], 0  ;;  %s3015_s0 = inlined_call_operand.hbm [shape: bf16[512,128], index: 0, kind: input, shape index: {}]   ;;  %s3016_s1 = inlined_call_operand.hbm [shape: bf16[128,512], index: 1, kind: input, shape index: {}]   ;;  %s3017_s2 = inlined_call_operand.vmem [shape: f32[1,512], index: 2, kind: input, shape index: {}]   ;;  %s3018_s3 = inlined_call_operand.hbm [shape: bf16[512,512], index: 3, kind: output, shape index: {}]  }
   0x1   :  { %9 = vsyncpa [#allocation6], 0 }
   0x2   :  { %10 = vsyncpa [#allocation4], 0  ;;  %s2614_s12 = smov [#allocation2]   ;;  %s2542_s16 = scalar_lea.hbm %s3015_s0, 4096 }
   0x3   :  { %s16_s13 = sshll.u32 %s2614_s12, 4  ;;  %p2543_p0 = scmp.ne.s32.totalorder %s3015_s0, %s2542_s16  ;;  %s17_s13 = int_to_ptr.vmem [resolvable:$true] %s16_s13 }
   0x4   :  { %p2546_p1 = scmp.lt.u32.totalorder %s2542_s16, %s3015_s0 }
   0x6   :  { %p2548_p2 = pnand %p2546_p1, %p2543_p0 }
   0x8   :  { %2551 = shalt.err (!%p2548_p2)
}
   0x9   :  { %s2552_s21 = scalar_lea.vmem %s17_s13, 4096  ;;  %p2557_p4 = scmp.lt.s32.totalorder %s17_s13, %s17_s13 }
   0xa   :  { %p2553_p3 = scmp.ne.s32.totalorder %s17_s13, %s2552_s21  ;;  %p2558_p5 = scmp.lt.s32.totalorder %s2552_s21, %s2552_s21 }
   0xc   :  { %p2559_p6 = por %p2558_p5, %p2557_p4 }
   0xe   :  { %p2560_p7 = pnand %p2559_p6, %p2553_p3 }
  0x10   :  { %2563 = shalt.err (!%p2560_p7)
}
  0x11   :  { %s2615_s22 = smov 64   ;;  %s2616_s23 = smov 4  }
  0x12   :  { %22 = dma.hbm_to_vmem [thread:$0]  %s3015_s0, 4096, %s17_s13, [#allocation3], %s2615_s22, %s2615_s22, %s2616_s23  }
  0x13   :  { %s2617_s26 = smov [#allocation5]   ;;  %s2564_s30 = scalar_lea.hbm %s3016_s1, 4096 }
  0x14   :  { %s28_s27 = sshll.u32 %s2617_s26, 4  ;;  %p2565_p8 = scmp.ne.s32.totalorder %s3016_s1, %s2564_s30  ;;  %s29_s27 = int_to_ptr.vmem [resolvable:$true] %s28_s27 }
  0x15   :  { %p2568_p9 = scmp.lt.u32.totalorder %s2564_s30, %s3016_s1 }
  0x17   :  { %p2570_p10 = pnand %p2568_p9, %p2565_p8 }
  0x19   :  { %2573 = shalt.err (!%p2570_p10)
}
  0x1a   :  { %s2574_s8 = scalar_lea.vmem %s29_s27, 4096  ;;  %p2579_p12 = scmp.lt.s32.totalorder %s29_s27, %s29_s27 }
  0x1b   :  { %p2575_p11 = scmp.ne.s32.totalorder %s29_s27, %s2574_s8  ;;  %p2580_p13 = scmp.lt.s32.totalorder %s2574_s8, %s2574_s8 }
  0x1d   :  { %p2581_p0 = por %p2580_p13, %p2579_p12 }
  0x1f   :  { %p2582_p1 = pnand %p2581_p0, %p2575_p11 }
  0x21   :  { %2585 = shalt.err (!%p2582_p1)
}
  0x22   :  { %s2618_s0 = smov 256   ;;  %s2619_s9 = smov 16  }
  0x23   :  { %34 = dma.hbm_to_vmem [thread:$0]  %s3016_s1, 4096, %s29_s27, [#allocation6], %s2618_s0, %s2618_s0, %s2619_s9  }
  0x24   :  { %2608 = dma.done.wait [#allocation3], 4096  }
  0x25   :  { %2609 = vsyncadd [#allocation3], 4294963200 }
  0x26   :  { %2610 = dma.done.wait [#allocation6], 4096  }
  0x27   :  { %2611 = vsyncadd [#allocation6], 4294963200  ;;  %v2620_v0 = vmov 0   ;;  %v2462_v1 = vld [vmem:[#allocation5 + $0x4] ss:$16 sps:$4 sm:$0xff]   ;;  %v2511_v34 = vld [vmem:[#allocation2 + $0x8] sm:$0xff]   ;;  %v142_v59 = vlaneseq }
  0x28   :  { %546 = vmatprep.mubr.bf16.mxu0 %v2620_v0  ;;  %899 = vmatprep.mubr.bf16.mxu1 %v2620_v0  ;;  %v2464_v2 = vld [vmem:[#allocation5 + $0xc] ss:$16 sps:$4 sm:$0xff]   ;;  %v2466_v3 = vld [vmem:[#allocation5] ss:$16 sps:$4 sm:$0xff]   ;;  %v2467_v4 = vld [vmem:[#allocation5 + $0x8] ss:$16 sps:$4 sm:$0xff]  }
  0x29   :  { %514 = vmatprep.subr.bf16.mxu0 %v2462_v1  ;;  %867 = vmatprep.subr.bf16.mxu1 %v2464_v2  ;;  %v2468_v5 = vld [vmem:[#allocation5 + $0x24] ss:$16 sps:$4 sm:$0xff]   ;;  %v2470_v6 = vld [vmem:[#allocation5 + $0x2c] ss:$16 sps:$4 sm:$0xff]   ;;  %v2472_v7 = vld [vmem:[#allocation5 + $0x20] ss:$16 sps:$4 sm:$0xff]  }
  0x2a   :  { %515 = vmatpush1.bf16.msra.mxu0 %v2466_v3  ;;  %868 = vmatpush1.bf16.msra.mxu1 %v2467_v4  ;;  %v2473_v8 = vld [vmem:[#allocation5 + $0x28] ss:$16 sps:$4 sm:$0xff]   ;;  %v2474_v9 = vld [vmem:[#allocation5 + $0x44] ss:$16 sps:$4 sm:$0xff]   ;;  %v2476_v10 = vld [vmem:[#allocation5 + $0x4c] ss:$16 sps:$4 sm:$0xff]  }
  0x2b   :  { %516 = vmatprep.subr.bf16.mxu0 %v2468_v5  ;;  %869 = vmatprep.subr.bf16.mxu1 %v2470_v6  ;;  %v2478_v11 = vld [vmem:[#allocation5 + $0x40] ss:$16 sps:$4 sm:$0xff]   ;;  %v2479_v12 = vld [vmem:[#allocation5 + $0x48] ss:$16 sps:$4 sm:$0xff]   ;;  %v2480_v13 = vld [vmem:[#allocation5 + $0x64] ss:$16 sps:$4 sm:$0xff]  }
  0x2c   :  { %v2482_v14 = vld [vmem:[#allocation5 + $0x6c] ss:$16 sps:$4 sm:$0xff]   ;;  %v2484_v15 = vld [vmem:[#allocation5 + $0x60] ss:$16 sps:$4 sm:$0xff]   ;;  %v2485_v16 = vld [vmem:[#allocation5 + $0x68] ss:$16 sps:$4 sm:$0xff]  }
  0x2d   :  { %v2486_v17 = vld [vmem:[#allocation5 + $0x84] ss:$16 sps:$4 sm:$0xff]   ;;  %v2488_v18 = vld [vmem:[#allocation5 + $0x8c] ss:$16 sps:$4 sm:$0xff]   ;;  %v2490_v19 = vld [vmem:[#allocation5 + $0x80] ss:$16 sps:$4 sm:$0xff]  }
  0x2e   :  { %517 = vmatpush1.bf16.msra.mxu0 %v2472_v7  ;;  %870 = vmatpush1.bf16.msra.mxu1 %v2473_v8  ;;  %v2491_v20 = vld [vmem:[#allocation5 + $0x88] ss:$16 sps:$4 sm:$0xff]   ;;  %v2492_v21 = vld [vmem:[#allocation5 + $0xa4] ss:$16 sps:$4 sm:$0xff]   ;;  %v2494_v22 = vld [vmem:[#allocation5 + $0xac] ss:$16 sps:$4 sm:$0xff]  }
  0x2f   :  { %518 = vmatprep.subr.bf16.mxu0 %v2474_v9  ;;  %871 = vmatprep.subr.bf16.mxu1 %v2476_v10  ;;  %v2496_v23 = vld [vmem:[#allocation5 + $0xa0] ss:$16 sps:$4 sm:$0xff]   ;;  %v2497_v24 = vld [vmem:[#allocation5 + $0xa8] ss:$16 sps:$4 sm:$0xff]   ;;  %v2498_v25 = vld [vmem:[#allocation5 + $0xc4] ss:$16 sps:$4 sm:$0xff]  }
  0x30   :  { %v2500_v26 = vld [vmem:[#allocation5 + $0xcc] ss:$16 sps:$4 sm:$0xff]   ;;  %v2502_v27 = vld [vmem:[#allocation5 + $0xc0] ss:$16 sps:$4 sm:$0xff]   ;;  %v2503_v28 = vld [vmem:[#allocation5 + $0xc8] ss:$16 sps:$4 sm:$0xff]  }
  0x31   :  { %v2504_v29 = vld [vmem:[#allocation5 + $0xe4] ss:$16 sps:$4 sm:$0xff]   ;;  %v2506_v30 = vld [vmem:[#allocation5 + $0xec] ss:$16 sps:$4 sm:$0xff]   ;;  %v2508_v31 = vld [vmem:[#allocation5 + $0xe0] ss:$16 sps:$4 sm:$0xff]  }
  0x32   :  { %519 = vmatpush1.bf16.msra.mxu0 %v2478_v11  ;;  %872 = vmatpush1.bf16.msra.mxu1 %v2479_v12  ;;  %v2509_v32 = vld [vmem:[#allocation5 + $0xe8] ss:$16 sps:$4 sm:$0xff]   ;;  %v2510_v33 = vld [vmem:[#allocation2] sm:$0xff]   ;;  %v2512_v35 = vld [vmem:[#allocation2 + $0x10] sm:$0xff]   ;;  %v143_v60 = vshrl.u32 %v142_v59, 7 }
  0x33   :  { %520 = vmatprep.subr.bf16.mxu0 %v2480_v13  ;;  %873 = vmatprep.subr.bf16.mxu1 %v2482_v14  ;;  %v2513_v36 = vld [vmem:[#allocation2 + $0x18] sm:$0xff]   ;;  %v2514_v37 = vld [vmem:[#allocation2 + $0x20] sm:$0xff]   ;;  %v2515_v38 = vld [vmem:[#allocation2 + $0x28] sm:$0xff]  }
  0x34   :  { %v2516_v39 = vld [vmem:[#allocation2 + $0x30] sm:$0xff]   ;;  %v2517_v40 = vld [vmem:[#allocation2 + $0x38] sm:$0xff]   ;;  %v2518_v41 = vld [vmem:[#allocation2 + $0x40] sm:$0xff]   ;;  %v144_v62 = vsub.s32 0, %v143_v60  ;;  %v152_v63 = vsub.s32 2, %v143_v60  ;;  %v148_v2 = vsub.s32 1, %v143_v60 }
  0x35   :  { %v2519_v42 = vld [vmem:[#allocation2 + $0x48] sm:$0xff]   ;;  %v2520_v43 = vld [vmem:[#allocation2 + $0x50] sm:$0xff]   ;;  %v2521_v44 = vld [vmem:[#allocation2 + $0x58] sm:$0xff]   ;;  %v156_v3 = vsub.s32 3, %v143_v60 }
  0x36   :  { %521 = vmatpush1.bf16.msra.mxu0 %v2484_v15  ;;  %874 = vmatpush1.bf16.msra.mxu1 %v2485_v16  ;;  %v2522_v45 = vld [vmem:[#allocation2 + $0x60] sm:$0xff]   ;;  %v2523_v46 = vld [vmem:[#allocation2 + $0x68] sm:$0xff]   ;;  %v2524_v47 = vld [vmem:[#allocation2 + $0x70] sm:$0xff]  }
  0x37   :  { %522 = vmatprep.subr.bf16.mxu0 %v2486_v17  ;;  %875 = vmatprep.subr.bf16.mxu1 %v2488_v18  ;;  %v2525_v48 = vld [vmem:[#allocation2 + $0x78] sm:$0xff]   ;;  %v2526_v49 = vld [vmem:[#allocation2 + $0x80] sm:$0xff]   ;;  %v2527_v50 = vld [vmem:[#allocation2 + $0x88] sm:$0xff]  }
  0x38   :  { %v2528_v51 = vld [vmem:[#allocation2 + $0x90] sm:$0xff]   ;;  %v2529_v52 = vld [vmem:[#allocation2 + $0x98] sm:$0xff]   ;;  %v2530_v53 = vld [vmem:[#allocation2 + $0xa0] sm:$0xff]  }
  0x39   :  { %v2531_v54 = vld [vmem:[#allocation2 + $0xa8] sm:$0xff]   ;;  %v2532_v55 = vld [vmem:[#allocation2 + $0xb0] sm:$0xff]   ;;  %v2533_v56 = vld [vmem:[#allocation2 + $0xb8] sm:$0xff]  }
  0x3a   :  { %523 = vmatpush1.bf16.msra.mxu0 %v2490_v19  ;;  %876 = vmatpush1.bf16.msra.mxu1 %v2491_v20  ;;  %v2534_v57 = vld [vmem:[#allocation2 + $0xc0] sm:$0xff]   ;;  %v2535_v58 = vld [vmem:[#allocation2 + $0xc8] sm:$0xff]   ;;  %v2536_v61 = vld [vmem:[#allocation2 + $0xd0] sm:$0xff]  }
  0x3b   :  { %524 = vmatprep.subr.bf16.mxu0 %v2492_v21  ;;  %877 = vmatprep.subr.bf16.mxu1 %v2494_v22  ;;  %v140_v1 = vld [vmem:[%s3017_s2] sm:$0xf]  ;;  %v2537_v14 = vld [vmem:[#allocation2 + $0xd8] sm:$0xff]   ;;  %s2621_s2 = smov [#allocation7]  }
  0x3c   :  { %v2726_v4 = vrot.slane %v140_v1, %v144_v62  ;;  %v2728_v5 = vrot.slane %v140_v1, %v152_v63  ;;  %v2730_v6 = vrot.slane %v140_v1, %v148_v2  ;;  %v2732_v7 = vrot.slane %v140_v1, %v156_v3  ;;  %s2121_s13 = sshll.u32 %s2621_s2, 4  ;;  %s2122_s13 = int_to_ptr.vmem [resolvable:$true] %s2121_s13 }
  0x3d   :  { %s2586_s14 = scalar_lea.vmem %s2122_s13, 16384  ;;  %p2591_p3 = scmp.lt.s32.totalorder %s2122_s13, %s2122_s13 }
  0x3e   :  { %525 = vmatpush1.bf16.msra.mxu0 %v2496_v23  ;;  %878 = vmatpush1.bf16.msra.mxu1 %v2497_v24  ;;  %p2587_p2 = scmp.ne.s32.totalorder %s2122_s13, %s2586_s14  ;;  %p2592_p4 = scmp.lt.s32.totalorder %s2586_s14, %s2586_s14 }
  0x3f   :  { %526 = vmatprep.subr.bf16.mxu0 %v2498_v25  ;;  %879 = vmatprep.subr.bf16.mxu1 %v2500_v26 }
  0x40   :  { %p2593_p5 = por %p2592_p4, %p2591_p3 }
  0x42   :  { %527 = vmatpush1.bf16.msra.mxu0 %v2502_v27  ;;  %880 = vmatpush1.bf16.msra.mxu1 %v2503_v28  ;;  %p2594_p6 = pnand %p2593_p5, %p2587_p2 }
  0x43   :  { %528 = vmatprep.subr.bf16.mxu0 %v2504_v29  ;;  %881 = vmatprep.subr.bf16.mxu1 %v2506_v30 }
  0x46   :  { %529 = vmatpush1.bf16.msra.mxu0 %v2508_v31  ;;  %882 = vmatpush1.bf16.msra.mxu1 %v2509_v32 }
  0x49   :  { %547 = vmatmul.mubr.bf16.vlgmr.msra.gmra.mrb[0].mxu0 %v2510_v33  ;;  %900 = vmatmul.mubr.bf16.vlgmr.msra.gmra.mrb[0].mxu1 %v2510_v33 }
  0x4a   :  { %556 = vmatprep.mubr.bf16.mxu0 %v2620_v0  ;;  %909 = vmatprep.mubr.bf16.mxu1 %v2620_v0 }
  0x51   :  { %557 = vmatmul.mubr.bf16.gmra.mrb[4].mxu0 %v2511_v34  ;;  %910 = vmatmul.mubr.bf16.gmra.mrb[4].mxu1 %v2511_v34 }
  0x52   :  { %566 = vmatprep.mubr.bf16.mxu0 %v2620_v0  ;;  %919 = vmatprep.mubr.bf16.mxu1 %v2620_v0 }
  0x59   :  { %567 = vmatmul.mubr.bf16.gmra.mrb[8].mxu0 %v2512_v35  ;;  %920 = vmatmul.mubr.bf16.gmra.mrb[8].mxu1 %v2512_v35  ;;  %v2538_v35 = vld [vmem:[#allocation2 + $0xe0] sm:$0xff]  }
  0x5a   :  { %576 = vmatprep.mubr.bf16.mxu0 %v2620_v0  ;;  %929 = vmatprep.mubr.bf16.mxu1 %v2620_v0 }
  0x61   :  { %577 = vmatmul.mubr.bf16.gmra.mrb[12].mxu0 %v2513_v36  ;;  %930 = vmatmul.mubr.bf16.gmra.mrb[12].mxu1 %v2513_v36 }
  0x62   :  { %586 = vmatprep.mubr.bf16.mxu0 %v2620_v0  ;;  %939 = vmatprep.mubr.bf16.mxu1 %v2620_v0 }
  0x69   :  { %587 = vmatmul.mubr.bf16.gmra.mrb[16].mxu0 %v2514_v37  ;;  %940 = vmatmul.mubr.bf16.gmra.mrb[16].mxu1 %v2514_v37 }
  0x6a   :  { %596 = vmatprep.mubr.bf16.mxu0 %v2620_v0  ;;  %949 = vmatprep.mubr.bf16.mxu1 %v2620_v0 }
  0x71   :  { %597 = vmatmul.mubr.bf16.gmra.mrb[20].mxu0 %v2515_v38  ;;  %950 = vmatmul.mubr.bf16.gmra.mrb[20].mxu1 %v2515_v38 }
  0x72   :  { %606 = vmatprep.mubr.bf16.mxu0 %v2620_v0  ;;  %959 = vmatprep.mubr.bf16.mxu1 %v2620_v0 }
  0x79   :  { %607 = vmatmul.mubr.bf16.gmra.mrb[24].mxu0 %v2516_v39  ;;  %960 = vmatmul.mubr.bf16.gmra.mrb[24].mxu1 %v2516_v39 }
  0x7a   :  { %616 = vmatprep.mubr.bf16.mxu0 %v2620_v0  ;;  %969 = vmatprep.mubr.bf16.mxu1 %v2620_v0 }
  0x81   :  { %617 = vmatmul.mubr.bf16.gmra.mrb[28].mxu0 %v2517_v40  ;;  %970 = vmatmul.mubr.bf16.gmra.mrb[28].mxu1 %v2517_v40 }
  0x82   :  { %626 = vmatprep.mubr.bf16.mxu0 %v2620_v0  ;;  %979 = vmatprep.mubr.bf16.mxu1 %v2620_v0 }
  0x89   :  { %627 = vmatmul.mubr.bf16.gmra.mrb[32].mxu0 %v2518_v41  ;;  %980 = vmatmul.mubr.bf16.gmra.mrb[32].mxu1 %v2518_v41 }
  0x8a   :  { %636 = vmatprep.mubr.bf16.mxu0 %v2620_v0  ;;  %989 = vmatprep.mubr.bf16.mxu1 %v2620_v0 }
  0x91   :  { %637 = vmatmul.mubr.bf16.gmra.mrb[36].mxu0 %v2519_v42  ;;  %990 = vmatmul.mubr.bf16.gmra.mrb[36].mxu1 %v2519_v42 }
  0x92   :  { %646 = vmatprep.mubr.bf16.mxu0 %v2620_v0  ;;  %999 = vmatprep.mubr.bf16.mxu1 %v2620_v0 }
  0x99   :  { %647 = vmatmul.mubr.bf16.gmra.mrb[40].mxu0 %v2520_v43  ;;  %1000 = vmatmul.mubr.bf16.gmra.mrb[40].mxu1 %v2520_v43 }
  0x9a   :  { %656 = vmatprep.mubr.bf16.mxu0 %v2620_v0  ;;  %1009 = vmatprep.mubr.bf16.mxu1 %v2620_v0 }
  0xa1   :  { %657 = vmatmul.mubr.bf16.gmra.mrb[44].mxu0 %v2521_v44  ;;  %1010 = vmatmul.mubr.bf16.gmra.mrb[44].mxu1 %v2521_v44 }
  0xa2   :  { %666 = vmatprep.mubr.bf16.mxu0 %v2620_v0  ;;  %1019 = vmatprep.mubr.bf16.mxu1 %v2620_v0 }
  0xa9   :  { %667 = vmatmul.mubr.bf16.gmra.mrb[48].mxu0 %v2522_v45  ;;  %1020 = vmatmul.mubr.bf16.gmra.mrb[48].mxu1 %v2522_v45 }
  0xaa   :  { %676 = vmatprep.mubr.bf16.mxu0 %v2620_v0  ;;  %1029 = vmatprep.mubr.bf16.mxu1 %v2620_v0 }
  0xb1   :  { %677 = vmatmul.mubr.bf16.gmra.mrb[52].mxu0 %v2523_v46  ;;  %1030 = vmatmul.mubr.bf16.gmra.mrb[52].mxu1 %v2523_v46 }
  0xb2   :  { %686 = vmatprep.mubr.bf16.mxu0 %v2620_v0  ;;  %1039 = vmatprep.mubr.bf16.mxu1 %v2620_v0 }
  0xb9   :  { %687 = vmatmul.mubr.bf16.gmra.mrb[56].mxu0 %v2524_v47  ;;  %1040 = vmatmul.mubr.bf16.gmra.mrb[56].mxu1 %v2524_v47 }
  0xba   :  { %696 = vmatprep.mubr.bf16.mxu0 %v2620_v0  ;;  %1049 = vmatprep.mubr.bf16.mxu1 %v2620_v0 }
  0xc1   :  { %697 = vmatmul.mubr.bf16.gmra.mrb[60].mxu0 %v2525_v48  ;;  %1050 = vmatmul.mubr.bf16.gmra.mrb[60].mxu1 %v2525_v48 }
  0xc2   :  { %706 = vmatprep.mubr.bf16.mxu0 %v2620_v0  ;;  %1059 = vmatprep.mubr.bf16.mxu1 %v2620_v0 }
  0xc9   :  { %707 = vmatmul.mubr.bf16.gmra.mrb[64].mxu0 %v2526_v49  ;;  %1060 = vmatmul.mubr.bf16.gmra.mrb[64].mxu1 %v2526_v49 }
  0xca   :  { %716 = vmatprep.mubr.bf16.mxu0 %v2620_v0  ;;  %1069 = vmatprep.mubr.bf16.mxu1 %v2620_v0 }
  0xd1   :  { %717 = vmatmul.mubr.bf16.gmra.mrb[68].mxu0 %v2527_v50  ;;  %1070 = vmatmul.mubr.bf16.gmra.mrb[68].mxu1 %v2527_v50 }
  0xd2   :  { %726 = vmatprep.mubr.bf16.mxu0 %v2620_v0  ;;  %1079 = vmatprep.mubr.bf16.mxu1 %v2620_v0 }
  0xd9   :  { %727 = vmatmul.mubr.bf16.gmra.mrb[72].mxu0 %v2528_v51  ;;  %1080 = vmatmul.mubr.bf16.gmra.mrb[72].mxu1 %v2528_v51 }
  0xda   :  { %736 = vmatprep.mubr.bf16.mxu0 %v2620_v0  ;;  %1089 = vmatprep.mubr.bf16.mxu1 %v2620_v0 }
  0xe1   :  { %737 = vmatmul.mubr.bf16.gmra.mrb[76].mxu0 %v2529_v52  ;;  %1090 = vmatmul.mubr.bf16.gmra.mrb[76].mxu1 %v2529_v52 }
  0xe2   :  { %746 = vmatprep.mubr.bf16.mxu0 %v2620_v0  ;;  %1099 = vmatprep.mubr.bf16.mxu1 %v2620_v0 }
  0xe9   :  { %747 = vmatmul.mubr.bf16.gmra.mrb[80].mxu0 %v2530_v53  ;;  %1100 = vmatmul.mubr.bf16.gmra.mrb[80].mxu1 %v2530_v53 }
  0xea   :  { %756 = vmatprep.mubr.bf16.mxu0 %v2620_v0  ;;  %1109 = vmatprep.mubr.bf16.mxu1 %v2620_v0 }
  0xf1   :  { %757 = vmatmul.mubr.bf16.gmra.mrb[84].mxu0 %v2531_v54  ;;  %1110 = vmatmul.mubr.bf16.gmra.mrb[84].mxu1 %v2531_v54 }
  0xf2   :  { %766 = vmatprep.mubr.bf16.mxu0 %v2620_v0  ;;  %1119 = vmatprep.mubr.bf16.mxu1 %v2620_v0 }
  0xf9   :  { %767 = vmatmul.mubr.bf16.gmra.mrb[88].mxu0 %v2532_v55  ;;  %1120 = vmatmul.mubr.bf16.gmra.mrb[88].mxu1 %v2532_v55 }
  0xfa   :  { %776 = vmatprep.mubr.bf16.mxu0 %v2620_v0  ;;  %1129 = vmatprep.mubr.bf16.mxu1 %v2620_v0 }
 0x101   :  { %777 = vmatmul.mubr.bf16.gmra.mrb[92].mxu0 %v2533_v56  ;;  %1130 = vmatmul.mubr.bf16.gmra.mrb[92].mxu1 %v2533_v56  ;;  %v2539_v56 = vld [vmem:[#allocation2 + $0xe8] sm:$0xff]  }
 0x102   :  { %786 = vmatprep.mubr.bf16.mxu0 %v2620_v0  ;;  %1139 = vmatprep.mubr.bf16.mxu1 %v2620_v0 }
 0x109   :  { %787 = vmatmul.mubr.bf16.gmra.mrb[96].mxu0 %v2534_v57  ;;  %1140 = vmatmul.mubr.bf16.gmra.mrb[96].mxu1 %v2534_v57 }
 0x10a   :  { %796 = vmatprep.mubr.bf16.mxu0 %v2620_v0  ;;  %1149 = vmatprep.mubr.bf16.mxu1 %v2620_v0 }
 0x111   :  { %797 = vmatmul.mubr.bf16.gmra.mrb[100].mxu0 %v2535_v58  ;;  %1150 = vmatmul.mubr.bf16.gmra.mrb[100].mxu1 %v2535_v58 }
 0x112   :  { %806 = vmatprep.mubr.bf16.mxu0 %v2620_v0  ;;  %1159 = vmatprep.mubr.bf16.mxu1 %v2620_v0 }
 0x119   :  { %807 = vmatmul.mubr.bf16.gmra.mrb[104].mxu0 %v2536_v61  ;;  %1160 = vmatmul.mubr.bf16.gmra.mrb[104].mxu1 %v2536_v61 }
 0x11a   :  { %816 = vmatprep.mubr.bf16.mxu0 %v2620_v0  ;;  %1169 = vmatprep.mubr.bf16.mxu1 %v2620_v0 }
 0x11c   :  { %v548_v8 = vpop.f32.mrb[0].mxu0  ;;  %v901_v9 = vpop.f32.mrb[0].mxu1 }
 0x11d   :  { %v549_v10 = vadd.f32 %v548_v8, %v2726_v4  ;;  %v902_v11 = vadd.f32 %v901_v9, %v2728_v5  ;;  %v550_v12 = vpop.f32.mrb[1].mxu0  ;;  %v903_v13 = vpop.f32.mrb[1].mxu1 }
 0x11e   :  { %v551_v15 = vadd.f32 %v550_v12, %v2730_v6  ;;  %v904_v16 = vadd.f32 %v903_v13, %v2732_v7  ;;  %v552_v17 = vpop.f32.mrb[2].mxu0  ;;  %v905_v18 = vpop.f32.mrb[2].mxu1 }
 0x11f   :  { %v553_v19 = vadd.f32 %v552_v17, %v2726_v4  ;;  %v906_v20 = vadd.f32 %v905_v18, %v2728_v5  ;;  %v554_v21 = vpop.f32.mrb[3].mxu0  ;;  %v907_v22 = vpop.f32.mrb[3].mxu1  ;;  %v2540_v18 = vld [vmem:[#allocation2 + $0xf0] sm:$0xff]  }
 0x120   :  { %v2326_v23 = vpack.c.bf16 %v551_v15, %v549_v10  ;;  %v2327_v24 = vpack.c.bf16 %v904_v16, %v902_v11  ;;  %v555_v25 = vadd.f32 %v554_v21, %v2730_v6  ;;  %v908_v26 = vadd.f32 %v907_v22, %v2732_v7 }
 0x121   :  { %817 = vmatmul.mubr.bf16.gmra.mrb[108].mxu0 %v2537_v14  ;;  %1170 = vmatmul.mubr.bf16.gmra.mrb[108].mxu1 %v2537_v14 }
 0x122   :  { %1988 = vst [vmem:[#allocation7] sm:$0xff] %v2326_v23  ;;  %1989 = vst [vmem:[#allocation7 + $0x8] sm:$0xff] %v2327_v24  ;;  %v2328_v27 = vpack.c.bf16 %v555_v25, %v553_v19  ;;  %v2329_v28 = vpack.c.bf16 %v908_v26, %v906_v20  ;;  %826 = vmatprep.mubr.bf16.mxu0 %v2620_v0  ;;  %1179 = vmatprep.mubr.bf16.mxu1 %v2620_v0 }
 0x124   :  { %1990 = vst [vmem:[#allocation7 + $0x10] sm:$0xff] %v2328_v27  ;;  %1991 = vst [vmem:[#allocation7 + $0x18] sm:$0xff] %v2329_v28  ;;  %v558_v29 = vpop.f32.mrb[4].mxu0  ;;  %v911_v30 = vpop.f32.mrb[4].mxu1 }
 0x125   :  { %v559_v31 = vadd.f32 %v558_v29, %v2726_v4  ;;  %v912_v32 = vadd.f32 %v911_v30, %v2728_v5  ;;  %v560_v33 = vpop.f32.mrb[5].mxu0  ;;  %v913_v34 = vpop.f32.mrb[5].mxu1 }
 0x126   :  { %v561_v36 = vadd.f32 %v560_v33, %v2730_v6  ;;  %v914_v37 = vadd.f32 %v913_v34, %v2732_v7  ;;  %v562_v38 = vpop.f32.mrb[6].mxu0  ;;  %v915_v39 = vpop.f32.mrb[6].mxu1 }
 0x127   :  { %v563_v40 = vadd.f32 %v562_v38, %v2726_v4  ;;  %v916_v41 = vadd.f32 %v915_v39, %v2728_v5  ;;  %v564_v42 = vpop.f32.mrb[7].mxu0  ;;  %v917_v43 = vpop.f32.mrb[7].mxu1  ;;  %v2541_v39 = vld [vmem:[#allocation2 + $0xf8] sm:$0xff]  }
 0x128   :  { %v2330_v44 = vpack.c.bf16 %v561_v36, %v559_v31  ;;  %v2331_v45 = vpack.c.bf16 %v914_v37, %v912_v32  ;;  %v565_v46 = vadd.f32 %v564_v42, %v2730_v6  ;;  %v918_v47 = vadd.f32 %v917_v43, %v2732_v7 }
 0x129   :  { %827 = vmatmul.mubr.bf16.gmra.mrb[112].mxu0 %v2538_v35  ;;  %1180 = vmatmul.mubr.bf16.gmra.mrb[112].mxu1 %v2538_v35 }
 0x12a   :  { %1992 = vst [vmem:[#allocation7 + $0x20] sm:$0xff] %v2330_v44  ;;  %1993 = vst [vmem:[#allocation7 + $0x28] sm:$0xff] %v2331_v45  ;;  %v2332_v48 = vpack.c.bf16 %v565_v46, %v563_v40  ;;  %v2333_v49 = vpack.c.bf16 %v918_v47, %v916_v41  ;;  %836 = vmatprep.mubr.bf16.mxu0 %v2620_v0  ;;  %1189 = vmatprep.mubr.bf16.mxu1 %v2620_v0 }
 0x12c   :  { %1994 = vst [vmem:[#allocation7 + $0x30] sm:$0xff] %v2332_v48  ;;  %1995 = vst [vmem:[#allocation7 + $0x38] sm:$0xff] %v2333_v49  ;;  %v568_v50 = vpop.f32.mrb[8].mxu0  ;;  %v921_v51 = vpop.f32.mrb[8].mxu1 }
 0x12d   :  { %v569_v52 = vadd.f32 %v568_v50, %v2726_v4  ;;  %v922_v53 = vadd.f32 %v921_v51, %v2728_v5  ;;  %v570_v54 = vpop.f32.mrb[9].mxu0  ;;  %v923_v55 = vpop.f32.mrb[9].mxu1 }
 0x12e   :  { %v571_v57 = vadd.f32 %v570_v54, %v2730_v6  ;;  %v924_v58 = vadd.f32 %v923_v55, %v2732_v7  ;;  %v572_v59 = vpop.f32.mrb[10].mxu0  ;;  %v925_v60 = vpop.f32.mrb[10].mxu1 }
 0x12f   :  { %v573_v61 = vadd.f32 %v572_v59, %v2726_v4  ;;  %v926_v62 = vadd.f32 %v925_v60, %v2728_v5  ;;  %v574_v63 = vpop.f32.mrb[11].mxu0  ;;  %v927_v1 = vpop.f32.mrb[11].mxu1 }
 0x130   :  { %v2334_v2 = vpack.c.bf16 %v571_v57, %v569_v52  ;;  %v2335_v3 = vpack.c.bf16 %v924_v58, %v922_v53  ;;  %v575_v8 = vadd.f32 %v574_v63, %v2730_v6  ;;  %v928_v9 = vadd.f32 %v927_v1, %v2732_v7 }
 0x131   :  { %837 = vmatmul.mubr.bf16.gmra.mrb[116].mxu0 %v2539_v56  ;;  %1190 = vmatmul.mubr.bf16.gmra.mrb[116].mxu1 %v2539_v56 }
 0x132   :  { %1996 = vst [vmem:[#allocation7 + $0x40] sm:$0xff] %v2334_v2  ;;  %1997 = vst [vmem:[#allocation7 + $0x48] sm:$0xff] %v2335_v3  ;;  %v2336_v10 = vpack.c.bf16 %v575_v8, %v573_v61  ;;  %v2337_v11 = vpack.c.bf16 %v928_v9, %v926_v62  ;;  %846 = vmatprep.mubr.bf16.mxu0 %v2620_v0  ;;  %1199 = vmatprep.mubr.bf16.mxu1 %v2620_v0 }
 0x134   :  { %1998 = vst [vmem:[#allocation7 + $0x50] sm:$0xff] %v2336_v10  ;;  %1999 = vst [vmem:[#allocation7 + $0x58] sm:$0xff] %v2337_v11  ;;  %v578_v12 = vpop.f32.mrb[12].mxu0  ;;  %v931_v13 = vpop.f32.mrb[12].mxu1 }
 0x135   :  { %v579_v14 = vadd.f32 %v578_v12, %v2726_v4  ;;  %v932_v15 = vadd.f32 %v931_v13, %v2728_v5  ;;  %v580_v16 = vpop.f32.mrb[13].mxu0  ;;  %v933_v17 = vpop.f32.mrb[13].mxu1 }
 0x136   :  { %v581_v19 = vadd.f32 %v580_v16, %v2730_v6  ;;  %v934_v20 = vadd.f32 %v933_v17, %v2732_v7  ;;  %v582_v21 = vpop.f32.mrb[14].mxu0  ;;  %v935_v22 = vpop.f32.mrb[14].mxu1 }
 0x137   :  { %v583_v23 = vadd.f32 %v582_v21, %v2726_v4  ;;  %v936_v24 = vadd.f32 %v935_v22, %v2728_v5  ;;  %v584_v25 = vpop.f32.mrb[15].mxu0  ;;  %v937_v26 = vpop.f32.mrb[15].mxu1 }
 0x138   :  { %v2338_v27 = vpack.c.bf16 %v581_v19, %v579_v14  ;;  %v2339_v28 = vpack.c.bf16 %v934_v20, %v932_v15  ;;  %v585_v29 = vadd.f32 %v584_v25, %v2730_v6  ;;  %v938_v30 = vadd.f32 %v937_v26, %v2732_v7 }
 0x139   :  { %847 = vmatmul.mubr.bf16.gmra.mrb[120].mxu0 %v2540_v18  ;;  %1200 = vmatmul.mubr.bf16.gmra.mrb[120].mxu1 %v2540_v18 }
 0x13a   :  { %2000 = vst [vmem:[#allocation7 + $0x60] sm:$0xff] %v2338_v27  ;;  %2001 = vst [vmem:[#allocation7 + $0x68] sm:$0xff] %v2339_v28  ;;  %v2340_v31 = vpack.c.bf16 %v585_v29, %v583_v23  ;;  %v2341_v32 = vpack.c.bf16 %v938_v30, %v936_v24  ;;  %856 = vmatprep.mubr.bf16.mxu0 %v2620_v0  ;;  %1209 = vmatprep.mubr.bf16.mxu1 %v2620_v0 }
 0x13c   :  { %2002 = vst [vmem:[#allocation7 + $0x70] sm:$0xff] %v2340_v31  ;;  %2003 = vst [vmem:[#allocation7 + $0x78] sm:$0xff] %v2341_v32  ;;  %v588_v33 = vpop.f32.mrb[16].mxu0  ;;  %v941_v34 = vpop.f32.mrb[16].mxu1 }
 0x13d   :  { %v589_v35 = vadd.f32 %v588_v33, %v2726_v4  ;;  %v942_v36 = vadd.f32 %v941_v34, %v2728_v5  ;;  %v590_v37 = vpop.f32.mrb[17].mxu0  ;;  %v943_v38 = vpop.f32.mrb[17].mxu1 }
 0x13e   :  { %v591_v40 = vadd.f32 %v590_v37, %v2730_v6  ;;  %v944_v41 = vadd.f32 %v943_v38, %v2732_v7  ;;  %v592_v42 = vpop.f32.mrb[18].mxu0  ;;  %v945_v43 = vpop.f32.mrb[18].mxu1 }
 0x13f   :  { %v593_v44 = vadd.f32 %v592_v42, %v2726_v4  ;;  %v946_v0 = vadd.f32 %v945_v43, %v2728_v5  ;;  %v594_v45 = vpop.f32.mrb[19].mxu0  ;;  %v947_v46 = vpop.f32.mrb[19].mxu1 }
 0x140   :  { %v2342_v47 = vpack.c.bf16 %v591_v40, %v589_v35  ;;  %v2343_v48 = vpack.c.bf16 %v944_v41, %v942_v36  ;;  %v595_v49 = vadd.f32 %v594_v45, %v2730_v6  ;;  %v948_v50 = vadd.f32 %v947_v46, %v2732_v7 }
 0x141   :  { %857 = vmatmul.mubr.bf16.gmra.mrb[124].mxu0 %v2541_v39  ;;  %1210 = vmatmul.mubr.bf16.gmra.mrb[124].mxu1 %v2541_v39 }
 0x142   :  { %2004 = vst [vmem:[#allocation7 + $0x80] sm:$0xff] %v2342_v47  ;;  %2005 = vst [vmem:[#allocation7 + $0x88] sm:$0xff] %v2343_v48  ;;  %v2344_v51 = vpack.c.bf16 %v595_v49, %v593_v44  ;;  %v2345_v52 = vpack.c.bf16 %v948_v50, %v946_v0 }
 0x144   :  { %2006 = vst [vmem:[#allocation7 + $0x90] sm:$0xff] %v2344_v51  ;;  %2007 = vst [vmem:[#allocation7 + $0x98] sm:$0xff] %v2345_v52  ;;  %v598_v53 = vpop.f32.mrb[20].mxu0  ;;  %v951_v54 = vpop.f32.mrb[20].mxu1 }
 0x145   :  { %v599_v55 = vadd.f32 %v598_v53, %v2726_v4  ;;  %v952_v56 = vadd.f32 %v951_v54, %v2728_v5  ;;  %v600_v57 = vpop.f32.mrb[21].mxu0  ;;  %v953_v58 = vpop.f32.mrb[21].mxu1 }
 0x146   :  { %v601_v59 = vadd.f32 %v600_v57, %v2730_v6  ;;  %v954_v60 = vadd.f32 %v953_v58, %v2732_v7  ;;  %v602_v61 = vpop.f32.mrb[22].mxu0  ;;  %v955_v62 = vpop.f32.mrb[22].mxu1 }
 0x147   :  { %v603_v63 = vadd.f32 %v602_v61, %v2726_v4  ;;  %v956_v1 = vadd.f32 %v955_v62, %v2728_v5  ;;  %v604_v2 = vpop.f32.mrb[23].mxu0  ;;  %v957_v3 = vpop.f32.mrb[23].mxu1 }
 0x148   :  { %v2346_v8 = vpack.c.bf16 %v601_v59, %v599_v55  ;;  %v2347_v9 = vpack.c.bf16 %v954_v60, %v952_v56  ;;  %v605_v10 = vadd.f32 %v604_v2, %v2730_v6  ;;  %v958_v11 = vadd.f32 %v957_v3, %v2732_v7 }
 0x14a   :  { %2008 = vst [vmem:[#allocation7 + $0xa0] sm:$0xff] %v2346_v8  ;;  %2009 = vst [vmem:[#allocation7 + $0xa8] sm:$0xff] %v2347_v9  ;;  %v2348_v12 = vpack.c.bf16 %v605_v10, %v603_v63  ;;  %v2349_v13 = vpack.c.bf16 %v958_v11, %v956_v1 }
 0x14c   :  { %2010 = vst [vmem:[#allocation7 + $0xb0] sm:$0xff] %v2348_v12  ;;  %2011 = vst [vmem:[#allocation7 + $0xb8] sm:$0xff] %v2349_v13  ;;  %v608_v14 = vpop.f32.mrb[24].mxu0  ;;  %v961_v15 = vpop.f32.mrb[24].mxu1 }
 0x14d   :  { %v609_v16 = vadd.f32 %v608_v14, %v2726_v4  ;;  %v962_v17 = vadd.f32 %v961_v15, %v2728_v5  ;;  %v610_v18 = vpop.f32.mrb[25].mxu0  ;;  %v963_v19 = vpop.f32.mrb[25].mxu1 }
 0x14e   :  { %v611_v20 = vadd.f32 %v610_v18, %v2730_v6  ;;  %v964_v21 = vadd.f32 %v963_v19, %v2732_v7  ;;  %v612_v22 = vpop.f32.mrb[26].mxu0  ;;  %v965_v23 = vpop.f32.mrb[26].mxu1 }
 0x14f   :  { %v613_v24 = vadd.f32 %v612_v22, %v2726_v4  ;;  %v966_v25 = vadd.f32 %v965_v23, %v2728_v5  ;;  %v614_v26 = vpop.f32.mrb[27].mxu0  ;;  %v967_v27 = vpop.f32.mrb[27].mxu1 }
 0x150   :  { %v2350_v28 = vpack.c.bf16 %v611_v20, %v609_v16  ;;  %v2351_v29 = vpack.c.bf16 %v964_v21, %v962_v17  ;;  %v615_v30 = vadd.f32 %v614_v26, %v2730_v6  ;;  %v968_v31 = vadd.f32 %v967_v27, %v2732_v7 }
 0x152   :  { %2012 = vst [vmem:[#allocation7 + $0xc0] sm:$0xff] %v2350_v28  ;;  %2013 = vst [vmem:[#allocation7 + $0xc8] sm:$0xff] %v2351_v29  ;;  %v2352_v32 = vpack.c.bf16 %v615_v30, %v613_v24  ;;  %v2353_v33 = vpack.c.bf16 %v968_v31, %v966_v25 }
 0x154   :  { %2014 = vst [vmem:[#allocation7 + $0xd0] sm:$0xff] %v2352_v32  ;;  %2015 = vst [vmem:[#allocation7 + $0xd8] sm:$0xff] %v2353_v33  ;;  %v618_v34 = vpop.f32.mrb[28].mxu0  ;;  %v971_v35 = vpop.f32.mrb[28].mxu1 }
 0x155   :  { %v619_v36 = vadd.f32 %v618_v34, %v2726_v4  ;;  %v972_v37 = vadd.f32 %v971_v35, %v2728_v5  ;;  %v620_v38 = vpop.f32.mrb[29].mxu0  ;;  %v973_v39 = vpop.f32.mrb[29].mxu1 }
 0x156   :  { %v621_v40 = vadd.f32 %v620_v38, %v2730_v6  ;;  %v974_v41 = vadd.f32 %v973_v39, %v2732_v7  ;;  %v622_v42 = vpop.f32.mrb[30].mxu0  ;;  %v975_v43 = vpop.f32.mrb[30].mxu1 }
 0x157   :  { %v623_v44 = vadd.f32 %v622_v42, %v2726_v4  ;;  %v976_v0 = vadd.f32 %v975_v43, %v2728_v5  ;;  %v624_v45 = vpop.f32.mrb[31].mxu0  ;;  %v977_v46 = vpop.f32.mrb[31].mxu1 }
 0x158   :  { %v2354_v47 = vpack.c.bf16 %v621_v40, %v619_v36  ;;  %v2355_v48 = vpack.c.bf16 %v974_v41, %v972_v37  ;;  %v625_v49 = vadd.f32 %v624_v45, %v2730_v6  ;;  %v978_v50 = vadd.f32 %v977_v46, %v2732_v7 }
 0x15a   :  { %2016 = vst [vmem:[#allocation7 + $0xe0] sm:$0xff] %v2354_v47  ;;  %2017 = vst [vmem:[#allocation7 + $0xe8] sm:$0xff] %v2355_v48  ;;  %v2356_v51 = vpack.c.bf16 %v625_v49, %v623_v44  ;;  %v2357_v52 = vpack.c.bf16 %v978_v50, %v976_v0 }
 0x15c   :  { %2018 = vst [vmem:[#allocation7 + $0xf0] sm:$0xff] %v2356_v51  ;;  %2019 = vst [vmem:[#allocation7 + $0xf8] sm:$0xff] %v2357_v52  ;;  %v628_v53 = vpop.f32.mrb[32].mxu0  ;;  %v981_v54 = vpop.f32.mrb[32].mxu1 }
 0x15d   :  { %v629_v55 = vadd.f32 %v628_v53, %v2726_v4  ;;  %v982_v56 = vadd.f32 %v981_v54, %v2728_v5  ;;  %v630_v57 = vpop.f32.mrb[33].mxu0  ;;  %v983_v58 = vpop.f32.mrb[33].mxu1 }
 0x15e   :  { %v631_v59 = vadd.f32 %v630_v57, %v2730_v6  ;;  %v984_v60 = vadd.f32 %v983_v58, %v2732_v7  ;;  %v632_v61 = vpop.f32.mrb[34].mxu0  ;;  %v985_v62 = vpop.f32.mrb[34].mxu1 }
 0x15f   :  { %v633_v63 = vadd.f32 %v632_v61, %v2726_v4  ;;  %v986_v1 = vadd.f32 %v985_v62, %v2728_v5  ;;  %v634_v2 = vpop.f32.mrb[35].mxu0  ;;  %v987_v3 = vpop.f32.mrb[35].mxu1 }
 0x160   :  { %v2358_v8 = vpack.c.bf16 %v631_v59, %v629_v55  ;;  %v2359_v9 = vpack.c.bf16 %v984_v60, %v982_v56  ;;  %v635_v10 = vadd.f32 %v634_v2, %v2730_v6  ;;  %v988_v11 = vadd.f32 %v987_v3, %v2732_v7 }
 0x162   :  { %2020 = vst [vmem:[#allocation7 + $0x100] sm:$0xff] %v2358_v8  ;;  %2021 = vst [vmem:[#allocation7 + $0x108] sm:$0xff] %v2359_v9  ;;  %v2360_v12 = vpack.c.bf16 %v635_v10, %v633_v63  ;;  %v2361_v13 = vpack.c.bf16 %v988_v11, %v986_v1 }
 0x164   :  { %2022 = vst [vmem:[#allocation7 + $0x110] sm:$0xff] %v2360_v12  ;;  %2023 = vst [vmem:[#allocation7 + $0x118] sm:$0xff] %v2361_v13  ;;  %v638_v14 = vpop.f32.mrb[36].mxu0  ;;  %v991_v15 = vpop.f32.mrb[36].mxu1 }
 0x165   :  { %v639_v16 = vadd.f32 %v638_v14, %v2726_v4  ;;  %v992_v17 = vadd.f32 %v991_v15, %v2728_v5  ;;  %v640_v18 = vpop.f32.mrb[37].mxu0  ;;  %v993_v19 = vpop.f32.mrb[37].mxu1 }
 0x166   :  { %v641_v20 = vadd.f32 %v640_v18, %v2730_v6  ;;  %v994_v21 = vadd.f32 %v993_v19, %v2732_v7  ;;  %v642_v22 = vpop.f32.mrb[38].mxu0  ;;  %v995_v23 = vpop.f32.mrb[38].mxu1 }
 0x167   :  { %v643_v24 = vadd.f32 %v642_v22, %v2726_v4  ;;  %v996_v25 = vadd.f32 %v995_v23, %v2728_v5  ;;  %v644_v26 = vpop.f32.mrb[39].mxu0  ;;  %v997_v27 = vpop.f32.mrb[39].mxu1 }
 0x168   :  { %v2362_v28 = vpack.c.bf16 %v641_v20, %v639_v16  ;;  %v2363_v29 = vpack.c.bf16 %v994_v21, %v992_v17  ;;  %v645_v30 = vadd.f32 %v644_v26, %v2730_v6  ;;  %v998_v31 = vadd.f32 %v997_v27, %v2732_v7 }
 0x16a   :  { %2024 = vst [vmem:[#allocation7 + $0x120] sm:$0xff] %v2362_v28  ;;  %2025 = vst [vmem:[#allocation7 + $0x128] sm:$0xff] %v2363_v29  ;;  %v2364_v32 = vpack.c.bf16 %v645_v30, %v643_v24  ;;  %v2365_v33 = vpack.c.bf16 %v998_v31, %v996_v25 }
 0x16c   :  { %2026 = vst [vmem:[#allocation7 + $0x130] sm:$0xff] %v2364_v32  ;;  %2027 = vst [vmem:[#allocation7 + $0x138] sm:$0xff] %v2365_v33  ;;  %v648_v34 = vpop.f32.mrb[40].mxu0  ;;  %v1001_v35 = vpop.f32.mrb[40].mxu1 }
 0x16d   :  { %v649_v36 = vadd.f32 %v648_v34, %v2726_v4  ;;  %v1002_v37 = vadd.f32 %v1001_v35, %v2728_v5  ;;  %v650_v38 = vpop.f32.mrb[41].mxu0  ;;  %v1003_v39 = vpop.f32.mrb[41].mxu1 }
 0x16e   :  { %v651_v40 = vadd.f32 %v650_v38, %v2730_v6  ;;  %v1004_v41 = vadd.f32 %v1003_v39, %v2732_v7  ;;  %v652_v42 = vpop.f32.mrb[42].mxu0  ;;  %v1005_v43 = vpop.f32.mrb[42].mxu1 }
 0x16f   :  { %v653_v44 = vadd.f32 %v652_v42, %v2726_v4  ;;  %v1006_v0 = vadd.f32 %v1005_v43, %v2728_v5  ;;  %v654_v45 = vpop.f32.mrb[43].mxu0  ;;  %v1007_v46 = vpop.f32.mrb[43].mxu1 }
 0x170   :  { %v2366_v47 = vpack.c.bf16 %v651_v40, %v649_v36  ;;  %v2367_v48 = vpack.c.bf16 %v1004_v41, %v1002_v37  ;;  %v655_v49 = vadd.f32 %v654_v45, %v2730_v6  ;;  %v1008_v50 = vadd.f32 %v1007_v46, %v2732_v7 }
 0x172   :  { %2028 = vst [vmem:[#allocation7 + $0x140] sm:$0xff] %v2366_v47  ;;  %2029 = vst [vmem:[#allocation7 + $0x148] sm:$0xff] %v2367_v48  ;;  %v2368_v51 = vpack.c.bf16 %v655_v49, %v653_v44  ;;  %v2369_v52 = vpack.c.bf16 %v1008_v50, %v1006_v0 }
 0x174   :  { %2030 = vst [vmem:[#allocation7 + $0x150] sm:$0xff] %v2368_v51  ;;  %2031 = vst [vmem:[#allocation7 + $0x158] sm:$0xff] %v2369_v52  ;;  %v658_v53 = vpop.f32.mrb[44].mxu0  ;;  %v1011_v54 = vpop.f32.mrb[44].mxu1 }
 0x175   :  { %v659_v55 = vadd.f32 %v658_v53, %v2726_v4  ;;  %v1012_v56 = vadd.f32 %v1011_v54, %v2728_v5  ;;  %v660_v57 = vpop.f32.mrb[45].mxu0  ;;  %v1013_v58 = vpop.f32.mrb[45].mxu1 }
 0x176   :  { %v661_v59 = vadd.f32 %v660_v57, %v2730_v6  ;;  %v1014_v60 = vadd.f32 %v1013_v58, %v2732_v7  ;;  %v662_v61 = vpop.f32.mrb[46].mxu0  ;;  %v1015_v62 = vpop.f32.mrb[46].mxu1 }
 0x177   :  { %v663_v63 = vadd.f32 %v662_v61, %v2726_v4  ;;  %v1016_v1 = vadd.f32 %v1015_v62, %v2728_v5  ;;  %v664_v2 = vpop.f32.mrb[47].mxu0  ;;  %v1017_v3 = vpop.f32.mrb[47].mxu1 }
 0x178   :  { %v2370_v8 = vpack.c.bf16 %v661_v59, %v659_v55  ;;  %v2371_v9 = vpack.c.bf16 %v1014_v60, %v1012_v56  ;;  %v665_v10 = vadd.f32 %v664_v2, %v2730_v6  ;;  %v1018_v11 = vadd.f32 %v1017_v3, %v2732_v7 }
 0x17a   :  { %2032 = vst [vmem:[#allocation7 + $0x160] sm:$0xff] %v2370_v8  ;;  %2033 = vst [vmem:[#allocation7 + $0x168] sm:$0xff] %v2371_v9  ;;  %v2372_v12 = vpack.c.bf16 %v665_v10, %v663_v63  ;;  %v2373_v13 = vpack.c.bf16 %v1018_v11, %v1016_v1 }
 0x17c   :  { %2034 = vst [vmem:[#allocation7 + $0x170] sm:$0xff] %v2372_v12  ;;  %2035 = vst [vmem:[#allocation7 + $0x178] sm:$0xff] %v2373_v13  ;;  %v668_v14 = vpop.f32.mrb[48].mxu0  ;;  %v1021_v15 = vpop.f32.mrb[48].mxu1 }
 0x17d   :  { %v669_v16 = vadd.f32 %v668_v14, %v2726_v4  ;;  %v1022_v17 = vadd.f32 %v1021_v15, %v2728_v5  ;;  %v670_v18 = vpop.f32.mrb[49].mxu0  ;;  %v1023_v19 = vpop.f32.mrb[49].mxu1 }
 0x17e   :  { %v671_v20 = vadd.f32 %v670_v18, %v2730_v6  ;;  %v1024_v21 = vadd.f32 %v1023_v19, %v2732_v7  ;;  %v672_v22 = vpop.f32.mrb[50].mxu0  ;;  %v1025_v23 = vpop.f32.mrb[50].mxu1 }
 0x17f   :  { %v673_v24 = vadd.f32 %v672_v22, %v2726_v4  ;;  %v1026_v25 = vadd.f32 %v1025_v23, %v2728_v5  ;;  %v674_v26 = vpop.f32.mrb[51].mxu0  ;;  %v1027_v27 = vpop.f32.mrb[51].mxu1 }
 0x180   :  { %v2374_v28 = vpack.c.bf16 %v671_v20, %v669_v16  ;;  %v2375_v29 = vpack.c.bf16 %v1024_v21, %v1022_v17  ;;  %v675_v30 = vadd.f32 %v674_v26, %v2730_v6  ;;  %v1028_v31 = vadd.f32 %v1027_v27, %v2732_v7 }
 0x182   :  { %2036 = vst [vmem:[#allocation7 + $0x180] sm:$0xff] %v2374_v28  ;;  %2037 = vst [vmem:[#allocation7 + $0x188] sm:$0xff] %v2375_v29  ;;  %v2376_v32 = vpack.c.bf16 %v675_v30, %v673_v24  ;;  %v2377_v33 = vpack.c.bf16 %v1028_v31, %v1026_v25 }
 0x184   :  { %2038 = vst [vmem:[#allocation7 + $0x190] sm:$0xff] %v2376_v32  ;;  %2039 = vst [vmem:[#allocation7 + $0x198] sm:$0xff] %v2377_v33  ;;  %v678_v34 = vpop.f32.mrb[52].mxu0  ;;  %v1031_v35 = vpop.f32.mrb[52].mxu1 }
 0x185   :  { %v679_v36 = vadd.f32 %v678_v34, %v2726_v4  ;;  %v1032_v37 = vadd.f32 %v1031_v35, %v2728_v5  ;;  %v680_v38 = vpop.f32.mrb[53].mxu0  ;;  %v1033_v39 = vpop.f32.mrb[53].mxu1 }
 0x186   :  { %v681_v40 = vadd.f32 %v680_v38, %v2730_v6  ;;  %v1034_v41 = vadd.f32 %v1033_v39, %v2732_v7  ;;  %v682_v42 = vpop.f32.mrb[54].mxu0  ;;  %v1035_v43 = vpop.f32.mrb[54].mxu1 }
 0x187   :  { %v683_v44 = vadd.f32 %v682_v42, %v2726_v4  ;;  %v1036_v0 = vadd.f32 %v1035_v43, %v2728_v5  ;;  %v684_v45 = vpop.f32.mrb[55].mxu0  ;;  %v1037_v46 = vpop.f32.mrb[55].mxu1 }
 0x188   :  { %v2378_v47 = vpack.c.bf16 %v681_v40, %v679_v36  ;;  %v2379_v48 = vpack.c.bf16 %v1034_v41, %v1032_v37  ;;  %v685_v49 = vadd.f32 %v684_v45, %v2730_v6  ;;  %v1038_v50 = vadd.f32 %v1037_v46, %v2732_v7 }
 0x18a   :  { %2040 = vst [vmem:[#allocation7 + $0x1a0] sm:$0xff] %v2378_v47  ;;  %2041 = vst [vmem:[#allocation7 + $0x1a8] sm:$0xff] %v2379_v48  ;;  %v2380_v51 = vpack.c.bf16 %v685_v49, %v683_v44  ;;  %v2381_v52 = vpack.c.bf16 %v1038_v50, %v1036_v0 }
 0x18c   :  { %2042 = vst [vmem:[#allocation7 + $0x1b0] sm:$0xff] %v2380_v51  ;;  %2043 = vst [vmem:[#allocation7 + $0x1b8] sm:$0xff] %v2381_v52  ;;  %v688_v53 = vpop.f32.mrb[56].mxu0  ;;  %v1041_v54 = vpop.f32.mrb[56].mxu1 }
 0x18d   :  { %v689_v55 = vadd.f32 %v688_v53, %v2726_v4  ;;  %v1042_v56 = vadd.f32 %v1041_v54, %v2728_v5  ;;  %v690_v57 = vpop.f32.mrb[57].mxu0  ;;  %v1043_v58 = vpop.f32.mrb[57].mxu1 }
 0x18e   :  { %v691_v59 = vadd.f32 %v690_v57, %v2730_v6  ;;  %v1044_v60 = vadd.f32 %v1043_v58, %v2732_v7  ;;  %v692_v61 = vpop.f32.mrb[58].mxu0  ;;  %v1045_v62 = vpop.f32.mrb[58].mxu1 }
 0x18f   :  { %v693_v63 = vadd.f32 %v692_v61, %v2726_v4  ;;  %v1046_v1 = vadd.f32 %v1045_v62, %v2728_v5  ;;  %v694_v2 = vpop.f32.mrb[59].mxu0  ;;  %v1047_v3 = vpop.f32.mrb[59].mxu1 }
 0x190   :  { %v2382_v8 = vpack.c.bf16 %v691_v59, %v689_v55  ;;  %v2383_v9 = vpack.c.bf16 %v1044_v60, %v1042_v56  ;;  %v695_v10 = vadd.f32 %v694_v2, %v2730_v6  ;;  %v1048_v11 = vadd.f32 %v1047_v3, %v2732_v7 }
 0x192   :  { %2044 = vst [vmem:[#allocation7 + $0x1c0] sm:$0xff] %v2382_v8  ;;  %2045 = vst [vmem:[#allocation7 + $0x1c8] sm:$0xff] %v2383_v9  ;;  %v2384_v12 = vpack.c.bf16 %v695_v10, %v693_v63  ;;  %v2385_v13 = vpack.c.bf16 %v1048_v11, %v1046_v1 }
 0x194   :  { %2046 = vst [vmem:[#allocation7 + $0x1d0] sm:$0xff] %v2384_v12  ;;  %2047 = vst [vmem:[#allocation7 + $0x1d8] sm:$0xff] %v2385_v13  ;;  %v698_v14 = vpop.f32.mrb[60].mxu0  ;;  %v1051_v15 = vpop.f32.mrb[60].mxu1 }
 0x195   :  { %v699_v16 = vadd.f32 %v698_v14, %v2726_v4  ;;  %v1052_v17 = vadd.f32 %v1051_v15, %v2728_v5  ;;  %v700_v18 = vpop.f32.mrb[61].mxu0  ;;  %v1053_v19 = vpop.f32.mrb[61].mxu1 }
 0x196   :  { %v701_v20 = vadd.f32 %v700_v18, %v2730_v6  ;;  %v1054_v21 = vadd.f32 %v1053_v19, %v2732_v7  ;;  %v702_v22 = vpop.f32.mrb[62].mxu0  ;;  %v1055_v23 = vpop.f32.mrb[62].mxu1 }
 0x197   :  { %v703_v24 = vadd.f32 %v702_v22, %v2726_v4  ;;  %v1056_v25 = vadd.f32 %v1055_v23, %v2728_v5  ;;  %v704_v26 = vpop.f32.mrb[63].mxu0  ;;  %v1057_v27 = vpop.f32.mrb[63].mxu1 }
 0x198   :  { %v2386_v28 = vpack.c.bf16 %v701_v20, %v699_v16  ;;  %v2387_v29 = vpack.c.bf16 %v1054_v21, %v1052_v17  ;;  %v705_v30 = vadd.f32 %v704_v26, %v2730_v6  ;;  %v1058_v31 = vadd.f32 %v1057_v27, %v2732_v7 }
 0x19a   :  { %2048 = vst [vmem:[#allocation7 + $0x1e0] sm:$0xff] %v2386_v28  ;;  %2049 = vst [vmem:[#allocation7 + $0x1e8] sm:$0xff] %v2387_v29  ;;  %v2388_v32 = vpack.c.bf16 %v705_v30, %v703_v24  ;;  %v2389_v33 = vpack.c.bf16 %v1058_v31, %v1056_v25 }
 0x19c   :  { %2050 = vst [vmem:[#allocation7 + $0x1f0] sm:$0xff] %v2388_v32  ;;  %2051 = vst [vmem:[#allocation7 + $0x1f8] sm:$0xff] %v2389_v33  ;;  %v708_v34 = vpop.f32.mrb[64].mxu0  ;;  %v1061_v35 = vpop.f32.mrb[64].mxu1 }
 0x19d   :  { %v709_v36 = vadd.f32 %v708_v34, %v2726_v4  ;;  %v1062_v37 = vadd.f32 %v1061_v35, %v2728_v5  ;;  %v710_v38 = vpop.f32.mrb[65].mxu0  ;;  %v1063_v39 = vpop.f32.mrb[65].mxu1 }
 0x19e   :  { %v711_v40 = vadd.f32 %v710_v38, %v2730_v6  ;;  %v1064_v41 = vadd.f32 %v1063_v39, %v2732_v7  ;;  %v712_v42 = vpop.f32.mrb[66].mxu0  ;;  %v1065_v43 = vpop.f32.mrb[66].mxu1 }
 0x19f   :  { %v713_v44 = vadd.f32 %v712_v42, %v2726_v4  ;;  %v1066_v0 = vadd.f32 %v1065_v43, %v2728_v5  ;;  %v714_v45 = vpop.f32.mrb[67].mxu0  ;;  %v1067_v46 = vpop.f32.mrb[67].mxu1 }
 0x1a0   :  { %v2390_v47 = vpack.c.bf16 %v711_v40, %v709_v36  ;;  %v2391_v48 = vpack.c.bf16 %v1064_v41, %v1062_v37  ;;  %v715_v49 = vadd.f32 %v714_v45, %v2730_v6  ;;  %v1068_v50 = vadd.f32 %v1067_v46, %v2732_v7 }
 0x1a2   :  { %2052 = vst [vmem:[#allocation7 + $0x200] sm:$0xff] %v2390_v47  ;;  %2053 = vst [vmem:[#allocation7 + $0x208] sm:$0xff] %v2391_v48  ;;  %v2392_v51 = vpack.c.bf16 %v715_v49, %v713_v44  ;;  %v2393_v52 = vpack.c.bf16 %v1068_v50, %v1066_v0 }
 0x1a4   :  { %2054 = vst [vmem:[#allocation7 + $0x210] sm:$0xff] %v2392_v51  ;;  %2055 = vst [vmem:[#allocation7 + $0x218] sm:$0xff] %v2393_v52  ;;  %v718_v53 = vpop.f32.mrb[68].mxu0  ;;  %v1071_v54 = vpop.f32.mrb[68].mxu1 }
 0x1a5   :  { %v719_v55 = vadd.f32 %v718_v53, %v2726_v4  ;;  %v1072_v56 = vadd.f32 %v1071_v54, %v2728_v5  ;;  %v720_v57 = vpop.f32.mrb[69].mxu0  ;;  %v1073_v58 = vpop.f32.mrb[69].mxu1 }
 0x1a6   :  { %v721_v59 = vadd.f32 %v720_v57, %v2730_v6  ;;  %v1074_v60 = vadd.f32 %v1073_v58, %v2732_v7  ;;  %v722_v61 = vpop.f32.mrb[70].mxu0  ;;  %v1075_v62 = vpop.f32.mrb[70].mxu1 }
 0x1a7   :  { %v723_v63 = vadd.f32 %v722_v61, %v2726_v4  ;;  %v1076_v1 = vadd.f32 %v1075_v62, %v2728_v5  ;;  %v724_v2 = vpop.f32.mrb[71].mxu0  ;;  %v1077_v3 = vpop.f32.mrb[71].mxu1 }
 0x1a8   :  { %v2394_v8 = vpack.c.bf16 %v721_v59, %v719_v55  ;;  %v2395_v9 = vpack.c.bf16 %v1074_v60, %v1072_v56  ;;  %v725_v10 = vadd.f32 %v724_v2, %v2730_v6  ;;  %v1078_v11 = vadd.f32 %v1077_v3, %v2732_v7 }
 0x1aa   :  { %2056 = vst [vmem:[#allocation7 + $0x220] sm:$0xff] %v2394_v8  ;;  %2057 = vst [vmem:[#allocation7 + $0x228] sm:$0xff] %v2395_v9  ;;  %v2396_v12 = vpack.c.bf16 %v725_v10, %v723_v63  ;;  %v2397_v13 = vpack.c.bf16 %v1078_v11, %v1076_v1 }
 0x1ac   :  { %2058 = vst [vmem:[#allocation7 + $0x230] sm:$0xff] %v2396_v12  ;;  %2059 = vst [vmem:[#allocation7 + $0x238] sm:$0xff] %v2397_v13  ;;  %v728_v14 = vpop.f32.mrb[72].mxu0  ;;  %v1081_v15 = vpop.f32.mrb[72].mxu1 }
 0x1ad   :  { %v729_v16 = vadd.f32 %v728_v14, %v2726_v4  ;;  %v1082_v17 = vadd.f32 %v1081_v15, %v2728_v5  ;;  %v730_v18 = vpop.f32.mrb[73].mxu0  ;;  %v1083_v19 = vpop.f32.mrb[73].mxu1 }
 0x1ae   :  { %v731_v20 = vadd.f32 %v730_v18, %v2730_v6  ;;  %v1084_v21 = vadd.f32 %v1083_v19, %v2732_v7  ;;  %v732_v22 = vpop.f32.mrb[74].mxu0  ;;  %v1085_v23 = vpop.f32.mrb[74].mxu1 }
 0x1af   :  { %v733_v24 = vadd.f32 %v732_v22, %v2726_v4  ;;  %v1086_v25 = vadd.f32 %v1085_v23, %v2728_v5  ;;  %v734_v26 = vpop.f32.mrb[75].mxu0  ;;  %v1087_v27 = vpop.f32.mrb[75].mxu1 }
 0x1b0   :  { %v2398_v28 = vpack.c.bf16 %v731_v20, %v729_v16  ;;  %v2399_v29 = vpack.c.bf16 %v1084_v21, %v1082_v17  ;;  %v735_v30 = vadd.f32 %v734_v26, %v2730_v6  ;;  %v1088_v31 = vadd.f32 %v1087_v27, %v2732_v7 }
 0x1b2   :  { %2060 = vst [vmem:[#allocation7 + $0x240] sm:$0xff] %v2398_v28  ;;  %2061 = vst [vmem:[#allocation7 + $0x248] sm:$0xff] %v2399_v29  ;;  %v2400_v32 = vpack.c.bf16 %v735_v30, %v733_v24  ;;  %v2401_v33 = vpack.c.bf16 %v1088_v31, %v1086_v25 }
 0x1b4   :  { %2062 = vst [vmem:[#allocation7 + $0x250] sm:$0xff] %v2400_v32  ;;  %2063 = vst [vmem:[#allocation7 + $0x258] sm:$0xff] %v2401_v33  ;;  %v738_v34 = vpop.f32.mrb[76].mxu0  ;;  %v1091_v35 = vpop.f32.mrb[76].mxu1 }
 0x1b5   :  { %v739_v36 = vadd.f32 %v738_v34, %v2726_v4  ;;  %v1092_v37 = vadd.f32 %v1091_v35, %v2728_v5  ;;  %v740_v38 = vpop.f32.mrb[77].mxu0  ;;  %v1093_v39 = vpop.f32.mrb[77].mxu1 }
 0x1b6   :  { %v741_v40 = vadd.f32 %v740_v38, %v2730_v6  ;;  %v1094_v41 = vadd.f32 %v1093_v39, %v2732_v7  ;;  %v742_v42 = vpop.f32.mrb[78].mxu0  ;;  %v1095_v43 = vpop.f32.mrb[78].mxu1 }
 0x1b7   :  { %v743_v44 = vadd.f32 %v742_v42, %v2726_v4  ;;  %v1096_v0 = vadd.f32 %v1095_v43, %v2728_v5  ;;  %v744_v45 = vpop.f32.mrb[79].mxu0  ;;  %v1097_v46 = vpop.f32.mrb[79].mxu1 }
 0x1b8   :  { %v2402_v47 = vpack.c.bf16 %v741_v40, %v739_v36  ;;  %v2403_v48 = vpack.c.bf16 %v1094_v41, %v1092_v37  ;;  %v745_v49 = vadd.f32 %v744_v45, %v2730_v6  ;;  %v1098_v50 = vadd.f32 %v1097_v46, %v2732_v7 }
 0x1ba   :  { %2064 = vst [vmem:[#allocation7 + $0x260] sm:$0xff] %v2402_v47  ;;  %2065 = vst [vmem:[#allocation7 + $0x268] sm:$0xff] %v2403_v48  ;;  %v2404_v51 = vpack.c.bf16 %v745_v49, %v743_v44  ;;  %v2405_v52 = vpack.c.bf16 %v1098_v50, %v1096_v0 }
 0x1bc   :  { %2066 = vst [vmem:[#allocation7 + $0x270] sm:$0xff] %v2404_v51  ;;  %2067 = vst [vmem:[#allocation7 + $0x278] sm:$0xff] %v2405_v52  ;;  %v748_v53 = vpop.f32.mrb[80].mxu0  ;;  %v1101_v54 = vpop.f32.mrb[80].mxu1 }
 0x1bd   :  { %v749_v55 = vadd.f32 %v748_v53, %v2726_v4  ;;  %v1102_v56 = vadd.f32 %v1101_v54, %v2728_v5  ;;  %v750_v57 = vpop.f32.mrb[81].mxu0  ;;  %v1103_v58 = vpop.f32.mrb[81].mxu1 }
 0x1be   :  { %v751_v59 = vadd.f32 %v750_v57, %v2730_v6  ;;  %v1104_v60 = vadd.f32 %v1103_v58, %v2732_v7  ;;  %v752_v61 = vpop.f32.mrb[82].mxu0  ;;  %v1105_v62 = vpop.f32.mrb[82].mxu1 }
 0x1bf   :  { %v753_v63 = vadd.f32 %v752_v61, %v2726_v4  ;;  %v1106_v1 = vadd.f32 %v1105_v62, %v2728_v5  ;;  %v754_v2 = vpop.f32.mrb[83].mxu0  ;;  %v1107_v3 = vpop.f32.mrb[83].mxu1 }
 0x1c0   :  { %v2406_v8 = vpack.c.bf16 %v751_v59, %v749_v55  ;;  %v2407_v9 = vpack.c.bf16 %v1104_v60, %v1102_v56  ;;  %v755_v10 = vadd.f32 %v754_v2, %v2730_v6  ;;  %v1108_v11 = vadd.f32 %v1107_v3, %v2732_v7 }
 0x1c2   :  { %2068 = vst [vmem:[#allocation7 + $0x280] sm:$0xff] %v2406_v8  ;;  %2069 = vst [vmem:[#allocation7 + $0x288] sm:$0xff] %v2407_v9  ;;  %v2408_v12 = vpack.c.bf16 %v755_v10, %v753_v63  ;;  %v2409_v13 = vpack.c.bf16 %v1108_v11, %v1106_v1 }
 0x1c4   :  { %2070 = vst [vmem:[#allocation7 + $0x290] sm:$0xff] %v2408_v12  ;;  %2071 = vst [vmem:[#allocation7 + $0x298] sm:$0xff] %v2409_v13  ;;  %v758_v14 = vpop.f32.mrb[84].mxu0  ;;  %v1111_v15 = vpop.f32.mrb[84].mxu1 }
 0x1c5   :  { %v759_v16 = vadd.f32 %v758_v14, %v2726_v4  ;;  %v1112_v17 = vadd.f32 %v1111_v15, %v2728_v5  ;;  %v760_v18 = vpop.f32.mrb[85].mxu0  ;;  %v1113_v19 = vpop.f32.mrb[85].mxu1 }
 0x1c6   :  { %v761_v20 = vadd.f32 %v760_v18, %v2730_v6  ;;  %v1114_v21 = vadd.f32 %v1113_v19, %v2732_v7  ;;  %v762_v22 = vpop.f32.mrb[86].mxu0  ;;  %v1115_v23 = vpop.f32.mrb[86].mxu1 }
 0x1c7   :  { %v763_v24 = vadd.f32 %v762_v22, %v2726_v4  ;;  %v1116_v25 = vadd.f32 %v1115_v23, %v2728_v5  ;;  %v764_v26 = vpop.f32.mrb[87].mxu0  ;;  %v1117_v27 = vpop.f32.mrb[87].mxu1 }
 0x1c8   :  { %v2410_v28 = vpack.c.bf16 %v761_v20, %v759_v16  ;;  %v2411_v29 = vpack.c.bf16 %v1114_v21, %v1112_v17  ;;  %v765_v30 = vadd.f32 %v764_v26, %v2730_v6  ;;  %v1118_v31 = vadd.f32 %v1117_v27, %v2732_v7 }
 0x1ca   :  { %2072 = vst [vmem:[#allocation7 + $0x2a0] sm:$0xff] %v2410_v28  ;;  %2073 = vst [vmem:[#allocation7 + $0x2a8] sm:$0xff] %v2411_v29  ;;  %v2412_v32 = vpack.c.bf16 %v765_v30, %v763_v24  ;;  %v2413_v33 = vpack.c.bf16 %v1118_v31, %v1116_v25 }
 0x1cc   :  { %2074 = vst [vmem:[#allocation7 + $0x2b0] sm:$0xff] %v2412_v32  ;;  %2075 = vst [vmem:[#allocation7 + $0x2b8] sm:$0xff] %v2413_v33  ;;  %v768_v34 = vpop.f32.mrb[88].mxu0  ;;  %v1121_v35 = vpop.f32.mrb[88].mxu1 }
 0x1cd   :  { %v769_v36 = vadd.f32 %v768_v34, %v2726_v4  ;;  %v1122_v37 = vadd.f32 %v1121_v35, %v2728_v5  ;;  %v770_v38 = vpop.f32.mrb[89].mxu0  ;;  %v1123_v39 = vpop.f32.mrb[89].mxu1 }
 0x1ce   :  { %v771_v40 = vadd.f32 %v770_v38, %v2730_v6  ;;  %v1124_v41 = vadd.f32 %v1123_v39, %v2732_v7  ;;  %v772_v42 = vpop.f32.mrb[90].mxu0  ;;  %v1125_v43 = vpop.f32.mrb[90].mxu1 }
 0x1cf   :  { %v773_v44 = vadd.f32 %v772_v42, %v2726_v4  ;;  %v1126_v0 = vadd.f32 %v1125_v43, %v2728_v5  ;;  %v774_v45 = vpop.f32.mrb[91].mxu0  ;;  %v1127_v46 = vpop.f32.mrb[91].mxu1 }
 0x1d0   :  { %v2414_v47 = vpack.c.bf16 %v771_v40, %v769_v36  ;;  %v2415_v48 = vpack.c.bf16 %v1124_v41, %v1122_v37  ;;  %v775_v49 = vadd.f32 %v774_v45, %v2730_v6  ;;  %v1128_v50 = vadd.f32 %v1127_v46, %v2732_v7 }
 0x1d2   :  { %2076 = vst [vmem:[#allocation7 + $0x2c0] sm:$0xff] %v2414_v47  ;;  %2077 = vst [vmem:[#allocation7 + $0x2c8] sm:$0xff] %v2415_v48  ;;  %v2416_v51 = vpack.c.bf16 %v775_v49, %v773_v44  ;;  %v2417_v52 = vpack.c.bf16 %v1128_v50, %v1126_v0 }
 0x1d4   :  { %2078 = vst [vmem:[#allocation7 + $0x2d0] sm:$0xff] %v2416_v51  ;;  %2079 = vst [vmem:[#allocation7 + $0x2d8] sm:$0xff] %v2417_v52  ;;  %v778_v53 = vpop.f32.mrb[92].mxu0  ;;  %v1131_v54 = vpop.f32.mrb[92].mxu1 }
 0x1d5   :  { %v779_v55 = vadd.f32 %v778_v53, %v2726_v4  ;;  %v1132_v56 = vadd.f32 %v1131_v54, %v2728_v5  ;;  %v780_v57 = vpop.f32.mrb[93].mxu0  ;;  %v1133_v58 = vpop.f32.mrb[93].mxu1 }
 0x1d6   :  { %v781_v59 = vadd.f32 %v780_v57, %v2730_v6  ;;  %v1134_v60 = vadd.f32 %v1133_v58, %v2732_v7  ;;  %v782_v61 = vpop.f32.mrb[94].mxu0  ;;  %v1135_v62 = vpop.f32.mrb[94].mxu1 }
 0x1d7   :  { %v783_v63 = vadd.f32 %v782_v61, %v2726_v4  ;;  %v1136_v1 = vadd.f32 %v1135_v62, %v2728_v5  ;;  %v784_v2 = vpop.f32.mrb[95].mxu0  ;;  %v1137_v3 = vpop.f32.mrb[95].mxu1 }
 0x1d8   :  { %v2418_v8 = vpack.c.bf16 %v781_v59, %v779_v55  ;;  %v2419_v9 = vpack.c.bf16 %v1134_v60, %v1132_v56  ;;  %v785_v10 = vadd.f32 %v784_v2, %v2730_v6  ;;  %v1138_v11 = vadd.f32 %v1137_v3, %v2732_v7 }
 0x1da   :  { %2080 = vst [vmem:[#allocation7 + $0x2e0] sm:$0xff] %v2418_v8  ;;  %2081 = vst [vmem:[#allocation7 + $0x2e8] sm:$0xff] %v2419_v9  ;;  %v2420_v12 = vpack.c.bf16 %v785_v10, %v783_v63  ;;  %v2421_v13 = vpack.c.bf16 %v1138_v11, %v1136_v1 }
 0x1dc   :  { %2082 = vst [vmem:[#allocation7 + $0x2f0] sm:$0xff] %v2420_v12  ;;  %2083 = vst [vmem:[#allocation7 + $0x2f8] sm:$0xff] %v2421_v13  ;;  %v788_v14 = vpop.f32.mrb[96].mxu0  ;;  %v1141_v15 = vpop.f32.mrb[96].mxu1 }
 0x1dd   :  { %v789_v16 = vadd.f32 %v788_v14, %v2726_v4  ;;  %v1142_v17 = vadd.f32 %v1141_v15, %v2728_v5  ;;  %v790_v18 = vpop.f32.mrb[97].mxu0  ;;  %v1143_v19 = vpop.f32.mrb[97].mxu1 }
 0x1de   :  { %v791_v20 = vadd.f32 %v790_v18, %v2730_v6  ;;  %v1144_v21 = vadd.f32 %v1143_v19, %v2732_v7  ;;  %v792_v22 = vpop.f32.mrb[98].mxu0  ;;  %v1145_v23 = vpop.f32.mrb[98].mxu1 }
 0x1df   :  { %v793_v24 = vadd.f32 %v792_v22, %v2726_v4  ;;  %v1146_v25 = vadd.f32 %v1145_v23, %v2728_v5  ;;  %v794_v26 = vpop.f32.mrb[99].mxu0  ;;  %v1147_v27 = vpop.f32.mrb[99].mxu1 }
 0x1e0   :  { %v2422_v28 = vpack.c.bf16 %v791_v20, %v789_v16  ;;  %v2423_v29 = vpack.c.bf16 %v1144_v21, %v1142_v17  ;;  %v795_v30 = vadd.f32 %v794_v26, %v2730_v6  ;;  %v1148_v31 = vadd.f32 %v1147_v27, %v2732_v7 }
 0x1e2   :  { %2084 = vst [vmem:[#allocation7 + $0x300] sm:$0xff] %v2422_v28  ;;  %2085 = vst [vmem:[#allocation7 + $0x308] sm:$0xff] %v2423_v29  ;;  %v2424_v32 = vpack.c.bf16 %v795_v30, %v793_v24  ;;  %v2425_v33 = vpack.c.bf16 %v1148_v31, %v1146_v25 }
 0x1e4   :  { %2086 = vst [vmem:[#allocation7 + $0x310] sm:$0xff] %v2424_v32  ;;  %2087 = vst [vmem:[#allocation7 + $0x318] sm:$0xff] %v2425_v33  ;;  %v798_v34 = vpop.f32.mrb[100].mxu0  ;;  %v1151_v35 = vpop.f32.mrb[100].mxu1 }
 0x1e5   :  { %v799_v36 = vadd.f32 %v798_v34, %v2726_v4  ;;  %v1152_v37 = vadd.f32 %v1151_v35, %v2728_v5  ;;  %v800_v38 = vpop.f32.mrb[101].mxu0  ;;  %v1153_v39 = vpop.f32.mrb[101].mxu1 }
 0x1e6   :  { %v801_v40 = vadd.f32 %v800_v38, %v2730_v6  ;;  %v1154_v41 = vadd.f32 %v1153_v39, %v2732_v7  ;;  %v802_v42 = vpop.f32.mrb[102].mxu0  ;;  %v1155_v43 = vpop.f32.mrb[102].mxu1 }
 0x1e7   :  { %v803_v44 = vadd.f32 %v802_v42, %v2726_v4  ;;  %v1156_v0 = vadd.f32 %v1155_v43, %v2728_v5  ;;  %v804_v45 = vpop.f32.mrb[103].mxu0  ;;  %v1157_v46 = vpop.f32.mrb[103].mxu1 }
 0x1e8   :  { %v2426_v47 = vpack.c.bf16 %v801_v40, %v799_v36  ;;  %v2427_v48 = vpack.c.bf16 %v1154_v41, %v1152_v37  ;;  %v805_v49 = vadd.f32 %v804_v45, %v2730_v6  ;;  %v1158_v50 = vadd.f32 %v1157_v46, %v2732_v7 }
 0x1ea   :  { %2088 = vst [vmem:[#allocation7 + $0x320] sm:$0xff] %v2426_v47  ;;  %2089 = vst [vmem:[#allocation7 + $0x328] sm:$0xff] %v2427_v48  ;;  %v2428_v51 = vpack.c.bf16 %v805_v49, %v803_v44  ;;  %v2429_v52 = vpack.c.bf16 %v1158_v50, %v1156_v0 }
 0x1ec   :  { %2090 = vst [vmem:[#allocation7 + $0x330] sm:$0xff] %v2428_v51  ;;  %2091 = vst [vmem:[#allocation7 + $0x338] sm:$0xff] %v2429_v52  ;;  %v808_v53 = vpop.f32.mrb[104].mxu0  ;;  %v1161_v54 = vpop.f32.mrb[104].mxu1 }
 0x1ed   :  { %v809_v55 = vadd.f32 %v808_v53, %v2726_v4  ;;  %v1162_v56 = vadd.f32 %v1161_v54, %v2728_v5  ;;  %v810_v57 = vpop.f32.mrb[105].mxu0  ;;  %v1163_v58 = vpop.f32.mrb[105].mxu1 }
 0x1ee   :  { %v811_v59 = vadd.f32 %v810_v57, %v2730_v6  ;;  %v1164_v60 = vadd.f32 %v1163_v58, %v2732_v7  ;;  %v812_v61 = vpop.f32.mrb[106].mxu0  ;;  %v1165_v62 = vpop.f32.mrb[106].mxu1 }
 0x1ef   :  { %v813_v63 = vadd.f32 %v812_v61, %v2726_v4  ;;  %v1166_v1 = vadd.f32 %v1165_v62, %v2728_v5  ;;  %v814_v2 = vpop.f32.mrb[107].mxu0  ;;  %v1167_v3 = vpop.f32.mrb[107].mxu1 }
 0x1f0   :  { %v2430_v8 = vpack.c.bf16 %v811_v59, %v809_v55  ;;  %v2431_v9 = vpack.c.bf16 %v1164_v60, %v1162_v56  ;;  %v815_v10 = vadd.f32 %v814_v2, %v2730_v6  ;;  %v1168_v11 = vadd.f32 %v1167_v3, %v2732_v7 }
 0x1f2   :  { %2092 = vst [vmem:[#allocation7 + $0x340] sm:$0xff] %v2430_v8  ;;  %2093 = vst [vmem:[#allocation7 + $0x348] sm:$0xff] %v2431_v9  ;;  %v2432_v12 = vpack.c.bf16 %v815_v10, %v813_v63  ;;  %v2433_v13 = vpack.c.bf16 %v1168_v11, %v1166_v1 }
 0x1f4   :  { %2094 = vst [vmem:[#allocation7 + $0x350] sm:$0xff] %v2432_v12  ;;  %2095 = vst [vmem:[#allocation7 + $0x358] sm:$0xff] %v2433_v13  ;;  %v818_v14 = vpop.f32.mrb[108].mxu0  ;;  %v1171_v15 = vpop.f32.mrb[108].mxu1 }
 0x1f5   :  { %v819_v16 = vadd.f32 %v818_v14, %v2726_v4  ;;  %v1172_v17 = vadd.f32 %v1171_v15, %v2728_v5  ;;  %v820_v18 = vpop.f32.mrb[109].mxu0  ;;  %v1173_v19 = vpop.f32.mrb[109].mxu1 }
 0x1f6   :  { %v821_v20 = vadd.f32 %v820_v18, %v2730_v6  ;;  %v1174_v21 = vadd.f32 %v1173_v19, %v2732_v7  ;;  %v822_v22 = vpop.f32.mrb[110].mxu0  ;;  %v1175_v23 = vpop.f32.mrb[110].mxu1 }
 0x1f7   :  { %v823_v24 = vadd.f32 %v822_v22, %v2726_v4  ;;  %v1176_v25 = vadd.f32 %v1175_v23, %v2728_v5  ;;  %v824_v26 = vpop.f32.mrb[111].mxu0  ;;  %v1177_v27 = vpop.f32.mrb[111].mxu1 }
 0x1f8   :  { %v2434_v28 = vpack.c.bf16 %v821_v20, %v819_v16  ;;  %v2435_v29 = vpack.c.bf16 %v1174_v21, %v1172_v17  ;;  %v825_v30 = vadd.f32 %v824_v26, %v2730_v6  ;;  %v1178_v31 = vadd.f32 %v1177_v27, %v2732_v7 }
 0x1fa   :  { %2096 = vst [vmem:[#allocation7 + $0x360] sm:$0xff] %v2434_v28  ;;  %2097 = vst [vmem:[#allocation7 + $0x368] sm:$0xff] %v2435_v29  ;;  %v2436_v32 = vpack.c.bf16 %v825_v30, %v823_v24  ;;  %v2437_v33 = vpack.c.bf16 %v1178_v31, %v1176_v25 }
 0x1fc   :  { %2098 = vst [vmem:[#allocation7 + $0x370] sm:$0xff] %v2436_v32  ;;  %2099 = vst [vmem:[#allocation7 + $0x378] sm:$0xff] %v2437_v33  ;;  %v828_v34 = vpop.f32.mrb[112].mxu0  ;;  %v1181_v35 = vpop.f32.mrb[112].mxu1 }
 0x1fd   :  { %v829_v36 = vadd.f32 %v828_v34, %v2726_v4  ;;  %v1182_v37 = vadd.f32 %v1181_v35, %v2728_v5  ;;  %v830_v38 = vpop.f32.mrb[113].mxu0  ;;  %v1183_v39 = vpop.f32.mrb[113].mxu1 }
 0x1fe   :  { %v831_v40 = vadd.f32 %v830_v38, %v2730_v6  ;;  %v1184_v41 = vadd.f32 %v1183_v39, %v2732_v7  ;;  %v832_v42 = vpop.f32.mrb[114].mxu0  ;;  %v1185_v43 = vpop.f32.mrb[114].mxu1 }
 0x1ff   :  { %v833_v44 = vadd.f32 %v832_v42, %v2726_v4  ;;  %v1186_v0 = vadd.f32 %v1185_v43, %v2728_v5  ;;  %v834_v45 = vpop.f32.mrb[115].mxu0  ;;  %v1187_v46 = vpop.f32.mrb[115].mxu1 }
 0x200   :  { %v2438_v47 = vpack.c.bf16 %v831_v40, %v829_v36  ;;  %v2439_v48 = vpack.c.bf16 %v1184_v41, %v1182_v37  ;;  %v835_v49 = vadd.f32 %v834_v45, %v2730_v6  ;;  %v1188_v50 = vadd.f32 %v1187_v46, %v2732_v7 }
 0x202   :  { %2100 = vst [vmem:[#allocation7 + $0x380] sm:$0xff] %v2438_v47  ;;  %2101 = vst [vmem:[#allocation7 + $0x388] sm:$0xff] %v2439_v48  ;;  %v2440_v51 = vpack.c.bf16 %v835_v49, %v833_v44  ;;  %v2441_v52 = vpack.c.bf16 %v1188_v50, %v1186_v0 }
 0x204   :  { %2102 = vst [vmem:[#allocation7 + $0x390] sm:$0xff] %v2440_v51  ;;  %2103 = vst [vmem:[#allocation7 + $0x398] sm:$0xff] %v2441_v52  ;;  %v838_v53 = vpop.f32.mrb[116].mxu0  ;;  %v1191_v54 = vpop.f32.mrb[116].mxu1 }
 0x205   :  { %v839_v55 = vadd.f32 %v838_v53, %v2726_v4  ;;  %v1192_v56 = vadd.f32 %v1191_v54, %v2728_v5  ;;  %v840_v57 = vpop.f32.mrb[117].mxu0  ;;  %v1193_v58 = vpop.f32.mrb[117].mxu1 }
 0x206   :  { %v841_v59 = vadd.f32 %v840_v57, %v2730_v6  ;;  %v1194_v60 = vadd.f32 %v1193_v58, %v2732_v7  ;;  %v842_v61 = vpop.f32.mrb[118].mxu0  ;;  %v1195_v62 = vpop.f32.mrb[118].mxu1 }
 0x207   :  { %v843_v63 = vadd.f32 %v842_v61, %v2726_v4  ;;  %v1196_v1 = vadd.f32 %v1195_v62, %v2728_v5  ;;  %v844_v2 = vpop.f32.mrb[119].mxu0  ;;  %v1197_v3 = vpop.f32.mrb[119].mxu1 }
 0x208   :  { %v2442_v8 = vpack.c.bf16 %v841_v59, %v839_v55  ;;  %v2443_v9 = vpack.c.bf16 %v1194_v60, %v1192_v56  ;;  %v845_v10 = vadd.f32 %v844_v2, %v2730_v6  ;;  %v1198_v11 = vadd.f32 %v1197_v3, %v2732_v7 }
 0x20a   :  { %2104 = vst [vmem:[#allocation7 + $0x3a0] sm:$0xff] %v2442_v8  ;;  %2105 = vst [vmem:[#allocation7 + $0x3a8] sm:$0xff] %v2443_v9  ;;  %v2444_v12 = vpack.c.bf16 %v845_v10, %v843_v63  ;;  %v2445_v13 = vpack.c.bf16 %v1198_v11, %v1196_v1 }
 0x20c   :  { %2106 = vst [vmem:[#allocation7 + $0x3b0] sm:$0xff] %v2444_v12  ;;  %2107 = vst [vmem:[#allocation7 + $0x3b8] sm:$0xff] %v2445_v13  ;;  %v848_v14 = vpop.f32.mrb[120].mxu0  ;;  %v1201_v15 = vpop.f32.mrb[120].mxu1 }
 0x20d   :  { %v849_v16 = vadd.f32 %v848_v14, %v2726_v4  ;;  %v1202_v17 = vadd.f32 %v1201_v15, %v2728_v5  ;;  %v850_v18 = vpop.f32.mrb[121].mxu0  ;;  %v1203_v19 = vpop.f32.mrb[121].mxu1 }
 0x20e   :  { %v851_v20 = vadd.f32 %v850_v18, %v2730_v6  ;;  %v1204_v21 = vadd.f32 %v1203_v19, %v2732_v7  ;;  %v852_v22 = vpop.f32.mrb[122].mxu0  ;;  %v1205_v23 = vpop.f32.mrb[122].mxu1 }
 0x20f   :  { %v853_v24 = vadd.f32 %v852_v22, %v2726_v4  ;;  %v1206_v25 = vadd.f32 %v1205_v23, %v2728_v5  ;;  %v854_v26 = vpop.f32.mrb[123].mxu0  ;;  %v1207_v27 = vpop.f32.mrb[123].mxu1 }
 0x210   :  { %v2446_v28 = vpack.c.bf16 %v851_v20, %v849_v16  ;;  %v2447_v29 = vpack.c.bf16 %v1204_v21, %v1202_v17  ;;  %v855_v30 = vadd.f32 %v854_v26, %v2730_v6  ;;  %v1208_v31 = vadd.f32 %v1207_v27, %v2732_v7 }
 0x212   :  { %2108 = vst [vmem:[#allocation7 + $0x3c0] sm:$0xff] %v2446_v28  ;;  %2109 = vst [vmem:[#allocation7 + $0x3c8] sm:$0xff] %v2447_v29  ;;  %v2448_v32 = vpack.c.bf16 %v855_v30, %v853_v24  ;;  %v2449_v33 = vpack.c.bf16 %v1208_v31, %v1206_v25 }
 0x214   :  { %2110 = vst [vmem:[#allocation7 + $0x3d0] sm:$0xff] %v2448_v32  ;;  %2111 = vst [vmem:[#allocation7 + $0x3d8] sm:$0xff] %v2449_v33  ;;  %v858_v34 = vpop.f32.mrb[124].mxu0  ;;  %v1211_v35 = vpop.f32.mrb[124].mxu1 }
 0x215   :  { %v859_v36 = vadd.f32 %v858_v34, %v2726_v4  ;;  %v1212_v37 = vadd.f32 %v1211_v35, %v2728_v5  ;;  %v860_v38 = vpop.f32.mrb[125].mxu0  ;;  %v1213_v39 = vpop.f32.mrb[125].mxu1 }
 0x216   :  { %v861_v40 = vadd.f32 %v860_v38, %v2730_v6  ;;  %v1214_v41 = vadd.f32 %v1213_v39, %v2732_v7  ;;  %v862_v42 = vpop.f32.mrb[126].mxu0  ;;  %v1215_v43 = vpop.f32.mrb[126].mxu1 }
 0x217   :  { %v863_v44 = vadd.f32 %v862_v42, %v2726_v4  ;;  %v1216_v0 = vadd.f32 %v1215_v43, %v2728_v5  ;;  %v864_v45 = vpop.f32.mrb[127].mxu0  ;;  %v1217_v46 = vpop.f32.mrb[127].mxu1 }
 0x218   :  { %v2450_v47 = vpack.c.bf16 %v861_v40, %v859_v36  ;;  %v2451_v48 = vpack.c.bf16 %v1214_v41, %v1212_v37  ;;  %v865_v49 = vadd.f32 %v864_v45, %v2730_v6  ;;  %v1218_v50 = vadd.f32 %v1217_v46, %v2732_v7 }
 0x21a   :  { %2112 = vst [vmem:[#allocation7 + $0x3e0] sm:$0xff] %v2450_v47  ;;  %2113 = vst [vmem:[#allocation7 + $0x3e8] sm:$0xff] %v2451_v48  ;;  %v2452_v51 = vpack.c.bf16 %v865_v49, %v863_v44  ;;  %v2453_v52 = vpack.c.bf16 %v1218_v50, %v1216_v0 }
 0x21c   :  { %2114 = vst [vmem:[#allocation7 + $0x3f0] sm:$0xff] %v2452_v51  ;;  %2115 = vst [vmem:[#allocation7 + $0x3f8] sm:$0xff] %v2453_v52 }
 0x21d   :  { %2597 = shalt.err (!%p2594_p6)
}
 0x21e   :  { %s2598_s17 = scalar_lea.hbm %s3018_s3, 16384 }
 0x21f   :  { %p2599_p7 = scmp.ne.s32.totalorder %s3018_s3, %s2598_s17  ;;  %p2602_p8 = scmp.lt.u32.totalorder %s2598_s17, %s3018_s3 }
 0x221   :  { %p2604_p9 = pnand %p2602_p8, %p2599_p7 }
 0x223   :  { %2607 = shalt.err (!%p2604_p9)
}
 0x224   :  { %2127 = dma.vmem_to_hbm [thread:$0]  %s2122_s13, 16384, %s3018_s3, [#allocation4], %s2618_s0, %s2618_s0, %s2619_s9  }
 0x225   :  { %2612 = dma.done.wait [#allocation4], 16384  }
 0x226   :  { %2613 = vsyncadd [#allocation4], 4294950912 }
 0x227   :  { %2131 = vsyncpa [#allocation3], 1 }
 0x228   :  { %2132 = vsyncpa [#allocation6], 1 }
 0x229   :  { %2133 = vsyncpa [#allocation4], 1 }

</bundles_post_ra>
